<compile_context>
chip_gen: v7x
topology: tpu7x:2x2x1
jax: 0.10.0
libtpu: 0.0.40
codegen_flags: <defaults>
</compile_context>

<pallas_src>
import jax
import jax.numpy as jnp
from jax import lax
from jax.experimental import pallas as pl
from jax.experimental.pallas import tpu as pltpu


def _round_up(x, m):
    return ((x + m - 1) // m) * m


def _pick_tm(M, target):
    """Largest divisor of M <= target that is a multiple of 16 (when possible)
    and leaves at least 2 grid programs (when M allows): avoids padding the
    patch matrix and keeps both v7x TensorCores busy."""
    cap = min(target, M)
    if M >= 32:
        cap = min(cap, M // 2)
    best = None
    for tm in range(cap, 0, -1):
        if M % tm == 0:
            if tm % 16 == 0:
                return tm
            if best is None:
                best = tm
    return best if best is not None else M


# ---------------------------------------------------------------------------
# Fused GEMM + folded-BN shift (+ LeakyReLU) Pallas kernel
# ---------------------------------------------------------------------------
def _make_gemm_kernel(leaky: bool):
    def kernel(p_ref, w_ref, t_ref, o_ref):
        acc = jnp.dot(p_ref[...], w_ref[...],
                      preferred_element_type=jnp.float32)   # bf16 MXU, f32 acc
        y = acc + t_ref[...]                                 # folded bias / BN shift
        if leaky:
            y = jnp.maximum(y, 0.01 * y)                     # LeakyReLU(0.01)
        o_ref[...] = y.astype(o_ref.dtype)
    return kernel


def _fused_gemm(p, w_bf16, t_f32, *, leaky, out_dtype, tm_target):
    """out = (M,K)@(K,N) + t  [+ LeakyReLU]; bf16 operands, f32 accumulate."""
    M, K = p.shape
    Kw, N = w_bf16.shape
    assert K == Kw
    p = p.astype(jnp.bfloat16)

    if M % 16 == 0:
        TM = _pick_tm(M, tm_target)           # exact divisor -> no padding copy
        Mp = M
    else:                                     # tiny Linear path (M == batch)
        TM = _round_up(min(M, tm_target), 8)
        Mp = _round_up(M, TM)
        p = jnp.pad(p, ((0, Mp - M), (0, 0)))

    out_bytes = Mp * N * jnp.dtype(out_dtype).itemsize
    cost = pl.CostEstimate(
        flops=2 * Mp * K * N,
        transcendentals=0,
        bytes_accessed=Mp * K * 2 + K * N * 2 + N * 4 + out_bytes,
    )

    out = pl.pallas_call(
        _make_gemm_kernel(leaky),
        out_shape=jax.ShapeDtypeStruct((Mp, N), out_dtype),
        grid_spec=pltpu.PrefetchScalarGridSpec(
            num_scalar_prefetch=0,
            grid=(Mp // TM,),
            in_specs=[
                pl.BlockSpec((TM, K), lambda i: (i, 0)),   # activations: streamed per tile
                pl.BlockSpec((K, N), lambda i: (0, 0)),    # weights: VMEM-resident
                pl.BlockSpec((1, N), lambda i: (0, 0)),    # fused bias/shift: resident
            ],
            out_specs=pl.BlockSpec((TM, N), lambda i: (i, 0)),
        ),
        compiler_params=pltpu.CompilerParams(
            dimension_semantics=("parallel",),
            vmem_limit_bytes=32 * 1024 * 1024,
        ),
        cost_estimate=cost,
    )(p, w_bf16, t_f32)
    return out[:M]


# ---------------------------------------------------------------------------
# im2col for Conv2d(kernel=4, stride=2, padding=1), NHWC input (no transposes)
# ---------------------------------------------------------------------------
def _im2col_nhwc(x_nhwc, K=4, S=2, P=1):
    """NHWC -> (B*OH*OW, K*K*C); column index = (kh*K + kw)*C + c."""
    B, H, W, C = x_nhwc.shape
    OH = (H + 2 * P - K) // S + 1
    OW = (W + 2 * P - K) // S + 1
    xp = jnp.pad(x_nhwc, ((0, 0), (P, P), (P, P), (0, 0)))
    cols = []
    for kh in range(K):
        for kw in range(K):
            cols.append(xp[:, kh:kh + S * (OH - 1) + 1:S,
                           kw:kw + S * (OW - 1) + 1:S, :])    # (B, OH, OW, C)
    pats = jnp.concatenate(cols, axis=-1)                     # (B, OH, OW, K*K*C)
    return pats.reshape(B * OH * OW, K * K * C), OH, OW


# ---------------------------------------------------------------------------
# Forward pass
# ---------------------------------------------------------------------------
_CONV_TM = {1: 2048, 2: 1024, 3: 512, 4: 512}   # per-layer row-tile targets


def discriminator_forward(x_nchw, params):
    """Pallas forward of DiscriminatorDCGAN_CelebA: returns (score, features)."""
    B = x_nchw.shape[0]
    # One-time NCHW -> NHWC; stay NHWC (and bf16) through all conv layers.
    h = jnp.transpose(x_nchw, (0, 2, 3, 1)).astype(jnp.bfloat16)
    for i in range(1, 5):
        pmat, OH, OW = _im2col_nhwc(h)
        w = params[f"wc{i}"]
        t = params[f"tc{i}"]
        out_dtype = jnp.float32 if i == 4 else jnp.bfloat16
        y = _fused_gemm(pmat, w, t, leaky=True, out_dtype=out_dtype,
                        tm_target=_CONV_TM[i])                # (B*OH*OW, Cout)
        h = y.reshape(B, OH, OW, w.shape[1])                  # stays NHWC

    # Tiny (B,4,4,512) relayout so features match PyTorch's NCHW .view(B, -1).
    features = jnp.transpose(h, (0, 3, 1, 2)).reshape(B, -1)  # (B, 8192) f32
    # Linear(4*4*512 -> 1): weights zero-padded to 128 output lanes so the
    # kernel's store is lane-dense; slice the real score column back out.
    score_pad = _fused_gemm(features, params["w5"], params["b5"],
                            leaky=False, out_dtype=jnp.float32, tm_target=256)
    score = score_pad[:, :1]
    return score, features


# ---------------------------------------------------------------------------
# Synthetic parameters (conv + BatchNorm folded, linear padded to 128 lanes)
# ---------------------------------------------------------------------------
def init_params(key, C):
    eps = 1e-5
    chans = [C, 64, 128, 256, 512]
    keys = jax.random.split(key, 26)
    ki = 0
    params = {}
    for i in range(1, 5):
        cin, cout = chans[i - 1], chans[i]
        w = 0.02 * jax.random.normal(keys[ki], (cout, cin, 4, 4), jnp.float32); ki += 1
        b = 0.01 * jax.random.normal(keys[ki], (cout,), jnp.float32); ki += 1
        gamma = 1.0 + 0.1 * jax.random.normal(keys[ki], (cout,), jnp.float32); ki += 1
        beta = 0.1 * jax.random.normal(keys[ki], (cout,), jnp.float32); ki += 1
        mean = 0.05 * jax.random.normal(keys[ki], (cout,), jnp.float32); ki += 1
        var = 1.0 + 0.2 * jax.random.uniform(keys[ki], (cout,), jnp.float32); ki += 1
        scale = gamma * lax.rsqrt(var + eps)                     # (Cout,)
        # (Cout, Cin, KH, KW) -> (KH, KW, Cin, Cout) -> (KH*KW*Cin, Cout)
        # row index = (kh*4 + kw)*Cin + c, matching _im2col_nhwc column order.
        w_mat = w.transpose(2, 3, 1, 0).reshape(cin * 16, cout)
        params[f"wc{i}"] = (w_mat * scale[None, :]).astype(jnp.bfloat16)
        params[f"tc{i}"] = ((b - mean) * scale + beta).reshape(1, cout)

    # Linear(4*4*512 -> 1), rows in NCHW-flatten order (c*16 + h*4 + w);
    # output lanes zero-padded to 128 for a lane-dense store.
    w5 = 0.02 * jax.random.normal(keys[ki], (4 * 4 * 512, 1), jnp.float32)
    b5 = 0.01 * jax.random.normal(keys[ki + 1], (1,), jnp.float32)
    w5_pad = jnp.zeros((4 * 4 * 512, 128), jnp.float32).at[:, :1].set(w5)
    b5_pad = jnp.zeros((1, 128), jnp.float32).at[0, 0].set(b5[0])
    params["w5"] = w5_pad.astype(jnp.bfloat16)
    params["b5"] = b5_pad
    return params


# ---------------------------------------------------------------------------
# Pure-JAX reference (same folded params / same bf16-with-f32-acc dtype path)
# ---------------------------------------------------------------------------
def _reference(x_nchw, params):
    B = x_nchw.shape[0]
    h = jnp.transpose(x_nchw, (0, 2, 3, 1)).astype(jnp.bfloat16)
    for i in range(1, 5):
        pmat, OH, OW = _im2col_nhwc(h)
        y = jnp.dot(pmat.astype(jnp.bfloat16), params[f"wc{i}"],
                    preferred_element_type=jnp.float32) + params[f"tc{i}"]
        y = jnp.maximum(y, 0.01 * y)
        out_dtype = jnp.float32 if i == 4 else jnp.bfloat16
        h = y.astype(out_dtype).reshape(B, OH, OW, params[f"wc{i}"].shape[1])
    features = jnp.transpose(h, (0, 3, 1, 2)).reshape(B, -1)
    score = (jnp.dot(features.astype(jnp.bfloat16), params["w5"],
                     preferred_element_type=jnp.float32) + params["b5"])[:, :1]
    return score, features


if __name__ == "__main__":
    # CelebA layout the module implies: 64x64 input -> 4x4x512 features.
    B, C, H, W = 2, 3, 64, 64
    key = jax.random.PRNGKey(0)
    kx, kp, kc = jax.random.split(key, 3)
    x = jax.random.normal(kx, (B, C, H, W), jnp.float32)
    params = init_params(kp, C)

    # Sanity: the NHWC im2col lowering reproduces a strided conv exactly (f32).
    x_nhwc = jnp.transpose(x, (0, 2, 3, 1))
    w_chk = 0.05 * jax.random.normal(kc, (4, 4, C, 8), jnp.float32)   # HWIO
    pmat, OH, OW = _im2col_nhwc(x_nhwc)
    via_mm = jnp.dot(pmat, w_chk.reshape(-1, 8),
                     precision=lax.Precision.HIGHEST).reshape(B, OH, OW, 8)
    via_conv = lax.conv_general_dilated(
        x_nhwc, w_chk, window_strides=(2, 2), padding=((1, 1), (1, 1)),
        dimension_numbers=("NHWC", "HWIO", "NHWC"),
        precision=lax.Precision.HIGHEST)
    assert jnp.allclose(via_mm, via_conv, atol=1e-3, rtol=1e-3)

    score, feats = discriminator_forward(x, params)
    jax.block_until_ready((score, feats))

    ref_score, ref_feats = _reference(x, params)
    assert score.shape == (B, 1) and feats.shape == (B, 4 * 4 * 512)
    assert jnp.allclose(feats, ref_feats, atol=2e-3, rtol=2e-3)
    assert jnp.allclose(score, ref_score, atol=2e-3, rtol=2e-3)

    print("KERNEL_OK")
</pallas_src>

<mosaic_0001>
module attributes {stable_mosaic.version = 11 : i64} {
  func.func @kernel(%arg0: i32, %arg1: memref<1024x48xbf16, #tpu.memory_space<vmem>>, %arg2: memref<48x64xbf16, #tpu.memory_space<vmem>>, %arg3: memref<1x64xf32, #tpu.memory_space<vmem>>, %arg4: memref<1024x64xbf16, #tpu.memory_space<vmem>>) attributes {dimension_semantics = [#tpu.dimension_semantics<parallel>], iteration_bounds = array<i64: 2>, scalar_prefetch = 0 : i64, scratch_operands = 0 : i64, tpu.core_type = #tpu.core_type<tc>, window_params = [{transform_indices = @transform_0, window_bounds = array<i64: 1024, 48>}, {pipeline_mode = #tpu.pipeline_mode<synchronous>, transform_indices = @transform_1, window_bounds = array<i64: 48, 64>}, {pipeline_mode = #tpu.pipeline_mode<synchronous>, transform_indices = @transform_2, window_bounds = array<i64: 1, 64>}, {transform_indices = @transform_3, window_bounds = array<i64: 1024, 64>}]} {
    %c0 = arith.constant 0 : index
    %c0_0 = arith.constant 0 : index
    %0 = vector.load %arg1[%c0, %c0_0] : memref<1024x48xbf16, #tpu.memory_space<vmem>>, vector<1024x48xbf16>
    %c0_1 = arith.constant 0 : index
    %c0_2 = arith.constant 0 : index
    %1 = vector.load %arg2[%c0_1, %c0_2] : memref<48x64xbf16, #tpu.memory_space<vmem>>, vector<48x64xbf16>
    %cst = arith.constant dense<0.000000e+00> : vector<1024x64xf32>
    %2 = tpu.matmul %0, %1, %cst {dimension_numbers = #tpu.dot_dimension_numbers<[1], [0], [0], [1], [0, 0, 1, 1], [], []>} : vector<1024x48xbf16>, vector<48x64xbf16>, vector<1024x64xf32> -> vector<1024x64xf32>
    %c0_3 = arith.constant 0 : index
    %c0_4 = arith.constant 0 : index
    %3 = vector.load %arg3[%c0_3, %c0_4] : memref<1x64xf32, #tpu.memory_space<vmem>>, vector<1x64xf32>
    %4 = vector.broadcast %3 : vector<1x64xf32> to vector<1024x64xf32>
    %5 = arith.addf %2, %4 : vector<1024x64xf32>
    %cst_5 = arith.constant 0.00999999977 : f32
    %6 = vector.broadcast %cst_5 : f32 to vector<1024x64xf32>
    %7 = arith.mulf %6, %5 : vector<1024x64xf32>
    %8 = arith.maximumf %5, %7 : vector<1024x64xf32>
    %9 = arith.truncf %8 : vector<1024x64xf32> to vector<1024x64xbf16>
    %c0_6 = arith.constant 0 : index
    %c0_7 = arith.constant 0 : index
    %10 = vector.load %arg4[%c0_6, %c0_7] : memref<1024x64xbf16, #tpu.memory_space<vmem>>, vector<1024x64xbf16>
    tpu.vector_store %arg4[%c0_6, %c0_7], %9 {strides = array<i32>} : memref<1024x64xbf16, #tpu.memory_space<vmem>>, vector<1024x64xbf16>,
    return
  }
  func.func @transform_0(%arg0: i32) -> (i32, i32) {
    %c0_i32 = arith.constant 0 : i32
    %c0_i32_0 = arith.constant 0 : i32
    return %arg0, %c0_i32 : i32, i32
  }
  func.func @transform_1(%arg0: i32) -> (i32, i32) {
    %c0_i32 = arith.constant 0 : i32
    %c0_i32_0 = arith.constant 0 : i32
    %c0_i32_1 = arith.constant 0 : i32
    return %c0_i32, %c0_i32_0 : i32, i32
  }
  func.func @transform_2(%arg0: i32) -> (i32, i32) {
    %c0_i32 = arith.constant 0 : i32
    %c0_i32_0 = arith.constant 0 : i32
    %c0_i32_1 = arith.constant 0 : i32
    return %c0_i32, %c0_i32_0 : i32, i32
  }
  func.func @transform_3(%arg0: i32) -> (i32, i32) {
    %c0_i32 = arith.constant 0 : i32
    %c0_i32_0 = arith.constant 0 : i32
    return %arg0, %c0_i32 : i32, i32
  }
}

</mosaic_0001>

<bundles_post_ra>
// kernel: tpu_custom_call.1
= control target key start
LH: loop header
LB: loop body
LE: loop exit
PB: predicated region body
PF: predicated region fallthrough
CT: control target
= control target key end

     0   :  { %s3055_s12 = smov 0   ;;  %s3614_s0 = inlined_call_operand.vmem [shape: bf16[2048,48], index: 0, kind: input, shape index: {}]   ;;  %s3615_s1 = inlined_call_operand.vmem [shape: bf16[48,64], index: 1, kind: input, shape index: {}]   ;;  %s3616_s2 = inlined_call_operand.vmem [shape: f32[1,64], index: 2, kind: input, shape index: {}]   ;;  %s3617_s3 = inlined_call_operand.vmem [shape: bf16[2048,64], index: 3, kind: output, shape index: {}]  }
   0x1 LB: > { %s2345_s13 = sadd.s32 4294967295, %s3033_s12   ;;  %p2349_p0 = scmp.ge.s32.totalorder %s3033_s12, 1  ;;  %s3033_s12 = sphi %s3055_s12, %s13_s12  }
   0x2   : > { %p138_p1 = scmp.lt.s32.totalorder %s3033_s12, 3 }
   0x4   : > { %p139_p2 = pnand %p2349_p0, %p138_p1 }
   0x5   : > { %v2959_v0 = vld [vmem:[%s3615_s1] sm:$0xff] (!%p139_p2)   ;;  %s2350_s16 = sshll.u32 (!%p139_p2), %s2345_s13, 7  ;;  %v2960_v1 = vld [vmem:[%s3615_s1 + $0x8] sm:$0xff] (!%p139_p2)   ;;  %v2961_v2 = vld [vmem:[%s3615_s1 + $0x10] sm:$0xff] (!%p139_p2)   ;;  %vm654_vm0 = vcmask (!%p139_p2), 392192   ;;  %vm2160_vm1 = vcmask (!%p139_p2), 519168  }
   0x6   : > { %142 = sbr.rel (%p139_p2) target bundleno = 371 (0x173), region = 32  ;;  %p163_p3 = scmp.lt.s32.totalorder (!%p139_p2), %s2350_s16, 255  ;;  %2811 = vmatprep.subr.bf16.mxu0 (!%p139_p2), %v2959_v0  ;;  %2945 = vmatprep.subr.bf16.mxu1 (!%p139_p2), %v2959_v0 }
   0x7   : > { %2812 = vmatpush3.bf16.msra.mxu0 (!%p139_p2), %v2959_v0  ;;  %2948 = vmatpush3.bf16.msra.mxu1 (!%p139_p2), %v2959_v0 }
   0x8   : > { %2813 = vmatprep.subr.bf16.mxu0 (!%p139_p2), %v2960_v1  ;;  %2946 = vmatprep.subr.bf16.mxu1 (!%p139_p2), %v2960_v1 }
   0xb   : > { %2814 = vmatpush3.bf16.msra.mxu0 (!%p139_p2), %v2960_v1  ;;  %2949 = vmatpush3.bf16.msra.mxu1 (!%p139_p2), %v2960_v1 }
   0xc   : > { %2815 = vmatprep.subr.bf16.mxu0 (!%p139_p2), %v2961_v2  ;;  %2947 = vmatprep.subr.bf16.mxu1 (!%p139_p2), %v2961_v2 }
   0xd   : > { %s3619_s16 = smov (!%p163_p3, %s2350_s16), 255 }
   0xe   : > { %s2351_s21 = sshll.u32 %s3619_s16, 2 }
   0xf   : > { %s3080_s24 = scalar_lea.vmem %s3614_s0, %s2351_s21  ;;  %2816 = vmatpush3.bf16.msra.mxu0 %v2961_v2  ;;  %2950 = vmatpush3.bf16.msra.mxu1 %v2961_v2  ;;  %s3228_s29 = scalar_lea.vmem %s3617_s3, %s2351_s21 }
  0x10   : > { %v2962_v3 = vld [vmem:[%s3080_s24] sm:$0xff]   ;;  %v2964_v5 = vld [vmem:[%s3080_s24 + $0x8] sm:$0xff]   ;;  %v2966_v7 = vld [vmem:[%s3080_s24 + $0x10] sm:$0xff]  }
  0x11   : > { %v2963_v4 = vld [vmem:[%s3080_s24 + $0x100] sm:$0xff]   ;;  %2817 = vmatprep.mubr.msk.bf16.mxu0 %vm654_vm0, %v2962_v3  ;;  %v2965_v6 = vld [vmem:[%s3080_s24 + $0x108] sm:$0xff]   ;;  %v2967_v8 = vld [vmem:[%s3080_s24 + $0x110] sm:$0xff]  }
  0x12   : > { %2881 = vmatprep.mubr.msk.bf16.mxu1 %vm654_vm0, %v2963_v4  ;;  %2818 = vmatmul.mubr.msk.bf16.vlgmr.msra.gmra.mrb[0].mxu0 %vm654_vm0, %v2964_v5  ;;  %v2968_v9 = vld [vmem:[%s3080_s24 + $0x18] sm:$0xff]   ;;  %v2970_v11 = vld [vmem:[%s3080_s24 + $0x20] sm:$0xff]   ;;  %v2972_v13 = vld [vmem:[%s3080_s24 + $0x28] sm:$0xff]  }
  0x13   : > { %2882 = vmatmul.mubr.msk.bf16.vlgmr.msra.gmra.mrb[0].mxu1 %vm654_vm0, %v2965_v6  ;;  %2821 = vmatprep.mubr.msk.bf16.mxu0 %vm654_vm0, %v2966_v7  ;;  %v2969_v10 = vld [vmem:[%s3080_s24 + $0x118] sm:$0xff]   ;;  %v2971_v12 = vld [vmem:[%s3080_s24 + $0x120] sm:$0xff]   ;;  %v2973_v14 = vld [vmem:[%s3080_s24 + $0x128] sm:$0xff]  }
  0x14   : > { %2885 = vmatprep.mubr.msk.bf16.mxu1 %vm654_vm0, %v2967_v8  ;;  %v2974_v15 = vld [vmem:[%s3080_s24 + $0x30] sm:$0xff]   ;;  %v2976_v17 = vld [vmem:[%s3080_s24 + $0x38] sm:$0xff]   ;;  %v2978_v19 = vld [vmem:[%s3080_s24 + $0x40] sm:$0xff]  }
  0x15   : > { %v2975_v16 = vld [vmem:[%s3080_s24 + $0x130] sm:$0xff]   ;;  %v2977_v18 = vld [vmem:[%s3080_s24 + $0x138] sm:$0xff]   ;;  %v2979_v20 = vld [vmem:[%s3080_s24 + $0x140] sm:$0xff]  }
  0x16   : > { %v2980_v21 = vld [vmem:[%s3080_s24 + $0x48] sm:$0xff]   ;;  %v2982_v23 = vld [vmem:[%s3080_s24 + $0x50] sm:$0xff]   ;;  %v2984_v25 = vld [vmem:[%s3080_s24 + $0x58] sm:$0xff]  }
  0x17   : > { %v2981_v22 = vld [vmem:[%s3080_s24 + $0x148] sm:$0xff]   ;;  %v2983_v24 = vld [vmem:[%s3080_s24 + $0x150] sm:$0xff]   ;;  %v2985_v26 = vld [vmem:[%s3080_s24 + $0x158] sm:$0xff]  }
  0x18   : > { %v2986_v27 = vld [vmem:[%s3080_s24 + $0x60] sm:$0xff]   ;;  %v2988_v29 = vld [vmem:[%s3080_s24 + $0x68] sm:$0xff]   ;;  %v2990_v31 = vld [vmem:[%s3080_s24 + $0x70] sm:$0xff]  }
  0x19   : > { %v2987_v28 = vld [vmem:[%s3080_s24 + $0x160] sm:$0xff]   ;;  %v2989_v30 = vld [vmem:[%s3080_s24 + $0x168] sm:$0xff]   ;;  %v2991_v32 = vld [vmem:[%s3080_s24 + $0x170] sm:$0xff]  }
  0x1a   : > { %2822 = vmatmul.mubr.msk.bf16.gmra.mrb[4].mxu0 %vm654_vm0, %v2968_v9  ;;  %v2992_v33 = vld [vmem:[%s3080_s24 + $0x78] sm:$0xff]   ;;  %v2994_v35 = vld [vmem:[%s3080_s24 + $0x80] sm:$0xff]   ;;  %v2996_v37 = vld [vmem:[%s3080_s24 + $0x88] sm:$0xff]  }
  0x1b   : > { %2886 = vmatmul.mubr.msk.bf16.gmra.mrb[4].mxu1 %vm654_vm0, %v2969_v10  ;;  %2825 = vmatprep.mubr.msk.bf16.mxu0 %vm654_vm0, %v2970_v11  ;;  %v2993_v34 = vld [vmem:[%s3080_s24 + $0x178] sm:$0xff]   ;;  %v2995_v36 = vld [vmem:[%s3080_s24 + $0x180] sm:$0xff]   ;;  %v2997_v38 = vld [vmem:[%s3080_s24 + $0x188] sm:$0xff]  }
  0x1c   : > { %2889 = vmatprep.mubr.msk.bf16.mxu1 %vm654_vm0, %v2971_v12  ;;  %v2998_v39 = vld [vmem:[%s3080_s24 + $0x90] sm:$0xff]   ;;  %v3000_v41 = vld [vmem:[%s3080_s24 + $0x98] sm:$0xff]   ;;  %v3002_v43 = vld [vmem:[%s3080_s24 + $0xa0] sm:$0xff]  }
  0x1d   : > { %v2999_v40 = vld [vmem:[%s3080_s24 + $0x190] sm:$0xff]   ;;  %v3001_v42 = vld [vmem:[%s3080_s24 + $0x198] sm:$0xff]   ;;  %v3003_v44 = vld [vmem:[%s3080_s24 + $0x1a0] sm:$0xff]  }
  0x1e   : > { %v3004_v45 = vld [vmem:[%s3080_s24 + $0xa8] sm:$0xff]   ;;  %v3006_v47 = vld [vmem:[%s3080_s24 + $0xb0] sm:$0xff]   ;;  %v3008_v49 = vld [vmem:[%s3080_s24 + $0xb8] sm:$0xff]  }
  0x1f   : > { %v3005_v46 = vld [vmem:[%s3080_s24 + $0x1a8] sm:$0xff]   ;;  %v3007_v48 = vld [vmem:[%s3080_s24 + $0x1b0] sm:$0xff]   ;;  %v3009_v50 = vld [vmem:[%s3080_s24 + $0x1b8] sm:$0xff]  }
  0x20   : > { %v3010_v51 = vld [vmem:[%s3080_s24 + $0xc0] sm:$0xff]   ;;  %v3012_v53 = vld [vmem:[%s3080_s24 + $0xc8] sm:$0xff]   ;;  %v3014_v55 = vld [vmem:[%s3080_s24 + $0xd0] sm:$0xff]  }
  0x21   : > { %v3011_v52 = vld [vmem:[%s3080_s24 + $0x1c0] sm:$0xff]   ;;  %v3013_v54 = vld [vmem:[%s3080_s24 + $0x1c8] sm:$0xff]   ;;  %v3015_v56 = vld [vmem:[%s3080_s24 + $0x1d0] sm:$0xff]  }
  0x22   : > { %2826 = vmatmul.mubr.msk.bf16.gmra.mrb[8].mxu0 %vm654_vm0, %v2972_v13  ;;  %v3016_v57 = vld [vmem:[%s3080_s24 + $0xd8] sm:$0xff]   ;;  %v3018_v59 = vld [vmem:[%s3080_s24 + $0xe0] sm:$0xff]   ;;  %v3020_v61 = vld [vmem:[%s3080_s24 + $0xe8] sm:$0xff]  }
  0x23   : > { %2890 = vmatmul.mubr.msk.bf16.gmra.mrb[8].mxu1 %vm654_vm0, %v2973_v14  ;;  %2829 = vmatprep.mubr.msk.bf16.mxu0 %vm654_vm0, %v2974_v15  ;;  %v3017_v58 = vld [vmem:[%s3080_s24 + $0x1d8] sm:$0xff]   ;;  %v3019_v60 = vld [vmem:[%s3080_s24 + $0x1e0] sm:$0xff]   ;;  %v3021_v62 = vld [vmem:[%s3080_s24 + $0x1e8] sm:$0xff]  }
  0x24   : > { %2893 = vmatprep.mubr.msk.bf16.mxu1 %vm654_vm0, %v2975_v16  ;;  %v3022_v63 = vld [vmem:[%s3080_s24 + $0xf0] sm:$0xff]   ;;  %v3024_v1 = vld [vmem:[%s3080_s24 + $0xf8] sm:$0xff]   ;;  %v3213_v3 = vld [vmem:[%s3616_s2] ss:$0 sm:$0xff] }
  0x25   : > { %v3023_v0 = vld [vmem:[%s3080_s24 + $0x1f0] sm:$0xff]   ;;  %v3025_v2 = vld [vmem:[%s3080_s24 + $0x1f8] sm:$0xff]  }
  0x2a   : > { %2830 = vmatmul.mubr.msk.bf16.gmra.mrb[12].mxu0 %vm654_vm0, %v2976_v17 }
  0x2b   : > { %2894 = vmatmul.mubr.msk.bf16.gmra.mrb[12].mxu1 %vm654_vm0, %v2977_v18  ;;  %2833 = vmatprep.mubr.msk.bf16.mxu0 %vm654_vm0, %v2978_v19 }
  0x2c   : > { %2897 = vmatprep.mubr.msk.bf16.mxu1 %vm654_vm0, %v2979_v20 }
  0x32   : > { %2834 = vmatmul.mubr.msk.bf16.gmra.mrb[16].mxu0 %vm654_vm0, %v2980_v21 }
  0x33   : > { %2898 = vmatmul.mubr.msk.bf16.gmra.mrb[16].mxu1 %vm654_vm0, %v2981_v22  ;;  %2837 = vmatprep.mubr.msk.bf16.mxu0 %vm654_vm0, %v2982_v23 }
  0x34   : > { %2901 = vmatprep.mubr.msk.bf16.mxu1 %vm654_vm0, %v2983_v24 }
  0x3a   : > { %2838 = vmatmul.mubr.msk.bf16.gmra.mrb[20].mxu0 %vm654_vm0, %v2984_v25 }
  0x3b   : > { %2902 = vmatmul.mubr.msk.bf16.gmra.mrb[20].mxu1 %vm654_vm0, %v2985_v26  ;;  %2841 = vmatprep.mubr.msk.bf16.mxu0 %vm654_vm0, %v2986_v27 }
  0x3c   : > { %2905 = vmatprep.mubr.msk.bf16.mxu1 %vm654_vm0, %v2987_v28 }
  0x42   : > { %2842 = vmatmul.mubr.msk.bf16.gmra.mrb[24].mxu0 %vm654_vm0, %v2988_v29 }
  0x43   : > { %2906 = vmatmul.mubr.msk.bf16.gmra.mrb[24].mxu1 %vm654_vm0, %v2989_v30  ;;  %2845 = vmatprep.mubr.msk.bf16.mxu0 %vm654_vm0, %v2990_v31 }
  0x44   : > { %2909 = vmatprep.mubr.msk.bf16.mxu1 %vm654_vm0, %v2991_v32 }
  0x4a   : > { %2846 = vmatmul.mubr.msk.bf16.gmra.mrb[28].mxu0 %vm654_vm0, %v2992_v33 }
  0x4b   : > { %2910 = vmatmul.mubr.msk.bf16.gmra.mrb[28].mxu1 %vm654_vm0, %v2993_v34  ;;  %2849 = vmatprep.mubr.msk.bf16.mxu0 %vm654_vm0, %v2994_v35 }
  0x4c   : > { %2913 = vmatprep.mubr.msk.bf16.mxu1 %vm654_vm0, %v2995_v36 }
  0x52   : > { %2850 = vmatmul.mubr.msk.bf16.gmra.mrb[32].mxu0 %vm654_vm0, %v2996_v37 }
  0x53   : > { %2914 = vmatmul.mubr.msk.bf16.gmra.mrb[32].mxu1 %vm654_vm0, %v2997_v38  ;;  %2853 = vmatprep.mubr.msk.bf16.mxu0 %vm654_vm0, %v2998_v39 }
  0x54   : > { %2917 = vmatprep.mubr.msk.bf16.mxu1 %vm654_vm0, %v2999_v40 }
  0x5a   : > { %2854 = vmatmul.mubr.msk.bf16.gmra.mrb[36].mxu0 %vm654_vm0, %v3000_v41 }
  0x5b   : > { %2918 = vmatmul.mubr.msk.bf16.gmra.mrb[36].mxu1 %vm654_vm0, %v3001_v42  ;;  %2857 = vmatprep.mubr.msk.bf16.mxu0 %vm654_vm0, %v3002_v43 }
  0x5c   : > { %2921 = vmatprep.mubr.msk.bf16.mxu1 %vm654_vm0, %v3003_v44 }
  0x62   : > { %2858 = vmatmul.mubr.msk.bf16.gmra.mrb[40].mxu0 %vm654_vm0, %v3004_v45 }
  0x63   : > { %2922 = vmatmul.mubr.msk.bf16.gmra.mrb[40].mxu1 %vm654_vm0, %v3005_v46  ;;  %2861 = vmatprep.mubr.msk.bf16.mxu0 %vm654_vm0, %v3006_v47 }
  0x64   : > { %2925 = vmatprep.mubr.msk.bf16.mxu1 %vm654_vm0, %v3007_v48 }
  0x6a   : > { %2862 = vmatmul.mubr.msk.bf16.gmra.mrb[44].mxu0 %vm654_vm0, %v3008_v49 }
  0x6b   : > { %2926 = vmatmul.mubr.msk.bf16.gmra.mrb[44].mxu1 %vm654_vm0, %v3009_v50  ;;  %2865 = vmatprep.mubr.msk.bf16.mxu0 %vm654_vm0, %v3010_v51 }
  0x6c   : > { %2929 = vmatprep.mubr.msk.bf16.mxu1 %vm654_vm0, %v3011_v52 }
  0x72   : > { %2866 = vmatmul.mubr.msk.bf16.gmra.mrb[48].mxu0 %vm654_vm0, %v3012_v53 }
  0x73   : > { %2930 = vmatmul.mubr.msk.bf16.gmra.mrb[48].mxu1 %vm654_vm0, %v3013_v54  ;;  %2869 = vmatprep.mubr.msk.bf16.mxu0 %vm654_vm0, %v3014_v55 }
  0x74   : > { %2933 = vmatprep.mubr.msk.bf16.mxu1 %vm654_vm0, %v3015_v56 }
  0x7a   : > { %2870 = vmatmul.mubr.msk.bf16.gmra.mrb[52].mxu0 %vm654_vm0, %v3016_v57 }
  0x7b   : > { %2934 = vmatmul.mubr.msk.bf16.gmra.mrb[52].mxu1 %vm654_vm0, %v3017_v58  ;;  %2873 = vmatprep.mubr.msk.bf16.mxu0 %vm654_vm0, %v3018_v59 }
  0x7c   : > { %2937 = vmatprep.mubr.msk.bf16.mxu1 %vm654_vm0, %v3019_v60 }
  0x82   : > { %2874 = vmatmul.mubr.msk.bf16.gmra.mrb[56].mxu0 %vm654_vm0, %v3020_v61 }
  0x83   : > { %2938 = vmatmul.mubr.msk.bf16.gmra.mrb[56].mxu1 %vm654_vm0, %v3021_v62  ;;  %2877 = vmatprep.mubr.msk.bf16.mxu0 %vm654_vm0, %v3022_v63 }
  0x84   : > { %2941 = vmatprep.mubr.msk.bf16.mxu1 %vm654_vm0, %v3023_v0 }
  0x8a   : > { %2878 = vmatmul.mubr.msk.bf16.gmra.mrb[60].mxu0 %vm654_vm0, %v3024_v1 }
  0x8b   : > { %2942 = vmatmul.mubr.msk.bf16.gmra.mrb[60].mxu1 %vm654_vm0, %v3025_v2 }
  0xe5   : > { %v2819_v4 = vpop.f32.mrb[0].mxu0 }
  0xe6   : > { %v2883_v5 = vpop.f32.mrb[0].mxu1  ;;  %v890_v6 = vadd.f32 %v2819_v4, %v3213_v3  ;;  %v881_v8 = vpop.f32.mrb[1].mxu0 }
  0xe7   : > { %v1146_v7 = vadd.f32 %v2883_v5, %v3213_v3  ;;  %v1137_v9 = vpop.f32.mrb[1].mxu1  ;;  %v882_v10 = vadd.f32 %v3213_v3, %v881_v8  ;;  %v2820_v12 = vpop.f32.mrb[2].mxu0 }
  0xe8   : > { %v1138_v11 = vadd.f32 %v3213_v3, %v1137_v9  ;;  %v2884_v13 = vpop.f32.mrb[2].mxu1  ;;  %v1394_v14 = vmul.f32 0.01, %v890_v6  ;;  %v893_v16 = vadd.f32 %v2820_v12, %v3213_v3  ;;  %v884_v18 = vpop.f32.mrb[3].mxu0 }
  0xe9   : > { %v1458_v15 = vmul.f32 0.01, %v1146_v7  ;;  %v1149_v17 = vadd.f32 %v2884_v13, %v3213_v3  ;;  %v1140_v19 = vpop.f32.mrb[3].mxu1  ;;  %v1392_v20 = vmul.f32 0.01, %v882_v10  ;;  %v885_v22 = vadd.f32 %v3213_v3, %v884_v18 }
  0xea   : > { %v1456_v21 = vmul.f32 0.01, %v1138_v11  ;;  %v1141_v23 = vadd.f32 %v3213_v3, %v1140_v19  ;;  %v1522_v24 = vmax.f32 %v890_v6, %v1394_v14  ;;  %v1395_v26 = vmul.f32 0.01, %v893_v16 }
  0xeb   : > { %v1586_v25 = vmax.f32 %v1146_v7, %v1458_v15  ;;  %v1459_v27 = vmul.f32 0.01, %v1149_v17  ;;  %v1520_v28 = vmax.f32 %v882_v10, %v1392_v20  ;;  %v1393_v30 = vmul.f32 0.01, %v885_v22 }
  0xec   : > { %v1584_v29 = vmax.f32 %v1138_v11, %v1456_v21  ;;  %v1457_v31 = vmul.f32 0.01, %v1141_v23  ;;  %v2618_v32 = vpack.c.bf16 %v1522_v24, %v1522_v24  ;;  %v1523_v34 = vmax.f32 %v893_v16, %v1395_v26 }
  0xed   : > { %v2682_v33 = vpack.c.bf16 %v1586_v25, %v1586_v25  ;;  %v1587_v35 = vmax.f32 %v1149_v17, %v1459_v27  ;;  %v2616_v36 = vpack.c.bf16 %v1520_v28, %v1520_v28  ;;  %v1521_v38 = vmax.f32 %v885_v22, %v1393_v30  ;;  %v2823_v40 = vpop.f32.mrb[4].mxu0 }
  0xee   : > { %v2680_v37 = vpack.c.bf16 %v1584_v29, %v1584_v29  ;;  %v1585_v39 = vmax.f32 %v1141_v23, %v1457_v31  ;;  %v2887_v41 = vpop.f32.mrb[4].mxu1  ;;  %2163 = vst.msk [vmem:[%s3228_s29 + $0x8] sm:$0xf] %vm2160_vm1, %v2618_v32  ;;  %v2619_v42 = vpack.c.bf16 %v1523_v34, %v1523_v34  ;;  %v906_v44 = vadd.f32 %v2823_v40, %v3213_v3  ;;  %v897_v46 = vpop.f32.mrb[5].mxu0 }
  0xef   : > { %2227 = vst.msk [vmem:[%s3228_s29 + $0x108] sm:$0xf] %vm2160_vm1, %v2682_v33  ;;  %v2683_v43 = vpack.c.bf16 %v1587_v35, %v1587_v35  ;;  %v1162_v45 = vadd.f32 %v2887_v41, %v3213_v3  ;;  %v1153_v47 = vpop.f32.mrb[5].mxu1  ;;  %2161 = vst.msk [vmem:[%s3228_s29] sm:$0xf] %vm2160_vm1, %v2616_v36  ;;  %v2617_v48 = vpack.c.bf16 %v1521_v38, %v1521_v38  ;;  %v2824_v52 = vpop.f32.mrb[6].mxu0 }
  0xf0   : > { %2225 = vst.msk [vmem:[%s3228_s29 + $0x100] sm:$0xf] %vm2160_vm1, %v2680_v37  ;;  %v2681_v49 = vpack.c.bf16 %v1585_v39, %v1585_v39  ;;  %v898_v50 = vadd.f32 %v3213_v3, %v897_v46  ;;  %v1154_v51 = vadd.f32 %v3213_v3, %v1153_v47  ;;  %v2888_v53 = vpop.f32.mrb[6].mxu1  ;;  %2164 = vst.msk [vmem:[%s3228_s29 + $0xc] sm:$0xf] %vm2160_vm1, %v2619_v42  ;;  %v900_v58 = vpop.f32.mrb[7].mxu0 }
  0xf1   : > { %2228 = vst.msk [vmem:[%s3228_s29 + $0x10c] sm:$0xf] %vm2160_vm1, %v2683_v43  ;;  %v1398_v54 = vmul.f32 0.01, %v906_v44  ;;  %v1462_v55 = vmul.f32 0.01, %v1162_v45  ;;  %v909_v56 = vadd.f32 %v2824_v52, %v3213_v3  ;;  %v1165_v57 = vadd.f32 %v2888_v53, %v3213_v3 }
  0xf2   : > { %v1156_v59 = vpop.f32.mrb[7].mxu1  ;;  %2162 = vst.msk [vmem:[%s3228_s29 + $0x4] sm:$0xf] %vm2160_vm1, %v2617_v48  ;;  %2226 = vst.msk [vmem:[%s3228_s29 + $0x104] sm:$0xf] %vm2160_vm1, %v2681_v49  ;;  %v901_v62 = vadd.f32 %v3213_v3, %v900_v58 }
  0xf3   : > { %v1396_v60 = vmul.f32 0.01, %v898_v50  ;;  %v1460_v61 = vmul.f32 0.01, %v1154_v51  ;;  %v1157_v63 = vadd.f32 %v3213_v3, %v1156_v59  ;;  %v1526_v0 = vmax.f32 %v906_v44, %v1398_v54 }
  0xf4   : > { %v1590_v1 = vmax.f32 %v1162_v45, %v1462_v55  ;;  %v1399_v2 = vmul.f32 0.01, %v909_v56  ;;  %v1463_v4 = vmul.f32 0.01, %v1165_v57  ;;  %v1397_v7 = vmul.f32 0.01, %v901_v62 }
  0xf5   : > { %v1524_v5 = vmax.f32 %v898_v50, %v1396_v60  ;;  %v1588_v6 = vmax.f32 %v1154_v51, %v1460_v61  ;;  %v1461_v8 = vmul.f32 0.01, %v1157_v63  ;;  %v2622_v9 = vpack.c.bf16 %v1526_v0, %v1526_v0  ;;  %v2827_v17 = vpop.f32.mrb[8].mxu0 }
  0xf6   : > { %v2686_v10 = vpack.c.bf16 %v1590_v1, %v1590_v1  ;;  %v1527_v11 = vmax.f32 %v909_v56, %v1399_v2  ;;  %v1591_v12 = vmax.f32 %v1165_v57, %v1463_v4  ;;  %v1525_v15 = vmax.f32 %v901_v62, %v1397_v7  ;;  %v2891_v18 = vpop.f32.mrb[8].mxu1  ;;  %v913_v23 = vpop.f32.mrb[9].mxu0 }
  0xf7   : > { %v2620_v13 = vpack.c.bf16 %v1524_v5, %v1524_v5  ;;  %v2684_v14 = vpack.c.bf16 %v1588_v6, %v1588_v6  ;;  %v1589_v16 = vmax.f32 %v1157_v63, %v1461_v8  ;;  %2167 = vst.msk [vmem:[%s3228_s29 + $0x18] sm:$0xf] %vm2160_vm1, %v2622_v9  ;;  %v922_v21 = vadd.f32 %v2827_v17, %v3213_v3  ;;  %v1169_v24 = vpop.f32.mrb[9].mxu1  ;;  %v2828_v29 = vpop.f32.mrb[10].mxu0 }
  0xf8   : > { %2231 = vst.msk [vmem:[%s3228_s29 + $0x118] sm:$0xf] %vm2160_vm1, %v2686_v10  ;;  %v2623_v19 = vpack.c.bf16 %v1527_v11, %v1527_v11  ;;  %v2687_v20 = vpack.c.bf16 %v1591_v12, %v1591_v12  ;;  %v1178_v22 = vadd.f32 %v2891_v18, %v3213_v3  ;;  %v2621_v25 = vpack.c.bf16 %v1525_v15, %v1525_v15  ;;  %v2892_v30 = vpop.f32.mrb[10].mxu1  ;;  %v916_v35 = vpop.f32.mrb[11].mxu0 }
  0xf9   : > { %2165 = vst.msk [vmem:[%s3228_s29 + $0x10] sm:$0xf] %vm2160_vm1, %v2620_v13  ;;  %2229 = vst.msk [vmem:[%s3228_s29 + $0x110] sm:$0xf] %vm2160_vm1, %v2684_v14  ;;  %v2685_v26 = vpack.c.bf16 %v1589_v16, %v1589_v16  ;;  %v914_v27 = vadd.f32 %v3213_v3, %v913_v23  ;;  %v1170_v28 = vadd.f32 %v3213_v3, %v1169_v24  ;;  %v1402_v31 = vmul.f32 0.01, %v922_v21 }
  0xfa   : > { %2168 = vst.msk [vmem:[%s3228_s29 + $0x1c] sm:$0xf] %vm2160_vm1, %v2623_v19  ;;  %2232 = vst.msk [vmem:[%s3228_s29 + $0x11c] sm:$0xf] %vm2160_vm1, %v2687_v20  ;;  %v1466_v32 = vmul.f32 0.01, %v1178_v22  ;;  %v925_v33 = vadd.f32 %v2828_v29, %v3213_v3  ;;  %v1181_v34 = vadd.f32 %v2892_v30, %v3213_v3  ;;  %v917_v39 = vadd.f32 %v3213_v3, %v916_v35 }
  0xfb   : > { %v1172_v36 = vpop.f32.mrb[11].mxu1  ;;  %2166 = vst.msk [vmem:[%s3228_s29 + $0x14] sm:$0xf] %vm2160_vm1, %v2621_v25  ;;  %2230 = vst.msk [vmem:[%s3228_s29 + $0x114] sm:$0xf] %vm2160_vm1, %v2685_v26  ;;  %v1530_v41 = vmax.f32 %v922_v21, %v1402_v31 }
  0xfc   : > { %v1400_v37 = vmul.f32 0.01, %v914_v27  ;;  %v1464_v38 = vmul.f32 0.01, %v1170_v28  ;;  %v1173_v40 = vadd.f32 %v3213_v3, %v1172_v36  ;;  %v1594_v42 = vmax.f32 %v1178_v22, %v1466_v32 }
  0xfd   : > { %v1403_v43 = vmul.f32 0.01, %v925_v33  ;;  %v1467_v44 = vmul.f32 0.01, %v1181_v34  ;;  %v1401_v47 = vmul.f32 0.01, %v917_v39  ;;  %v2626_v49 = vpack.c.bf16 %v1530_v41, %v1530_v41 }
  0xfe   : > { %v1528_v45 = vmax.f32 %v914_v27, %v1400_v37  ;;  %v1592_v46 = vmax.f32 %v1170_v28, %v1464_v38  ;;  %v1465_v48 = vmul.f32 0.01, %v1173_v40  ;;  %v2690_v50 = vpack.c.bf16 %v1594_v42, %v1594_v42  ;;  %v2831_v57 = vpop.f32.mrb[12].mxu0  ;;  %v2895_v58 = vpop.f32.mrb[12].mxu1 }
  0xff   : > { %v1531_v51 = vmax.f32 %v925_v33, %v1403_v43  ;;  %v1595_v52 = vmax.f32 %v1181_v34, %v1467_v44  ;;  %v1529_v55 = vmax.f32 %v917_v39, %v1401_v47  ;;  %2171 = vst.msk [vmem:[%s3228_s29 + $0x28] sm:$0xf] %vm2160_vm1, %v2626_v49  ;;  %v938_v61 = vadd.f32 %v2831_v57, %v3213_v3  ;;  %v929_v63 = vpop.f32.mrb[13].mxu0  ;;  %v1185_v0 = vpop.f32.mrb[13].mxu1 }
 0x100   : > { %v2624_v53 = vpack.c.bf16 %v1528_v45, %v1528_v45  ;;  %v2688_v54 = vpack.c.bf16 %v1592_v46, %v1592_v46  ;;  %v1593_v56 = vmax.f32 %v1173_v40, %v1465_v48  ;;  %2235 = vst.msk [vmem:[%s3228_s29 + $0x128] sm:$0xf] %vm2160_vm1, %v2690_v50  ;;  %v1194_v62 = vadd.f32 %v2895_v58, %v3213_v3  ;;  %v2832_v6 = vpop.f32.mrb[14].mxu0  ;;  %v2896_v7 = vpop.f32.mrb[14].mxu1 }
 0x101   : > { %v2627_v59 = vpack.c.bf16 %v1531_v51, %v1531_v51  ;;  %v2691_v60 = vpack.c.bf16 %v1595_v52, %v1595_v52  ;;  %v2625_v1 = vpack.c.bf16 %v1529_v55, %v1529_v55  ;;  %v930_v4 = vadd.f32 %v3213_v3, %v929_v63  ;;  %v932_v12 = vpop.f32.mrb[15].mxu0  ;;  %v1188_v13 = vpop.f32.mrb[15].mxu1 }
 0x102   : > { %2169 = vst.msk [vmem:[%s3228_s29 + $0x20] sm:$0xf] %vm2160_vm1, %v2624_v53  ;;  %2233 = vst.msk [vmem:[%s3228_s29 + $0x120] sm:$0xf] %vm2160_vm1, %v2688_v54  ;;  %v2689_v2 = vpack.c.bf16 %v1593_v56, %v1593_v56  ;;  %v1186_v5 = vadd.f32 %v3213_v3, %v1185_v0  ;;  %v1406_v8 = vmul.f32 0.01, %v938_v61  ;;  %v941_v10 = vadd.f32 %v2832_v6, %v3213_v3 }
 0x103   : > { %2172 = vst.msk [vmem:[%s3228_s29 + $0x2c] sm:$0xf] %vm2160_vm1, %v2627_v59  ;;  %2236 = vst.msk [vmem:[%s3228_s29 + $0x12c] sm:$0xf] %vm2160_vm1, %v2691_v60  ;;  %v1470_v9 = vmul.f32 0.01, %v1194_v62  ;;  %v1197_v11 = vadd.f32 %v2896_v7, %v3213_v3  ;;  %v933_v16 = vadd.f32 %v3213_v3, %v932_v12  ;;  %v1189_v17 = vadd.f32 %v3213_v3, %v1188_v13 }
 0x104   : > { %2170 = vst.msk [vmem:[%s3228_s29 + $0x24] sm:$0xf] %vm2160_vm1, %v2625_v1  ;;  %2234 = vst.msk [vmem:[%s3228_s29 + $0x124] sm:$0xf] %vm2160_vm1, %v2689_v2  ;;  %v1404_v14 = vmul.f32 0.01, %v930_v4  ;;  %v1534_v18 = vmax.f32 %v938_v61, %v1406_v8 }
 0x105   : > { %v1468_v15 = vmul.f32 0.01, %v1186_v5  ;;  %v1598_v19 = vmax.f32 %v1194_v62, %v1470_v9  ;;  %v1407_v20 = vmul.f32 0.01, %v941_v10  ;;  %v1471_v21 = vmul.f32 0.01, %v1197_v11 }
 0x106   : > { %v1532_v22 = vmax.f32 %v930_v4, %v1404_v14  ;;  %v1405_v24 = vmul.f32 0.01, %v933_v16  ;;  %v1469_v25 = vmul.f32 0.01, %v1189_v17  ;;  %v2630_v26 = vpack.c.bf16 %v1534_v18, %v1534_v18  ;;  %v2835_v34 = vpop.f32.mrb[16].mxu0  ;;  %v2899_v35 = vpop.f32.mrb[16].mxu1 }
 0x107   : > { %v1596_v23 = vmax.f32 %v1186_v5, %v1468_v15  ;;  %v2694_v27 = vpack.c.bf16 %v1598_v19, %v1598_v19  ;;  %v1535_v28 = vmax.f32 %v941_v10, %v1407_v20  ;;  %v1599_v29 = vmax.f32 %v1197_v11, %v1471_v21  ;;  %v945_v40 = vpop.f32.mrb[17].mxu0  ;;  %v1201_v41 = vpop.f32.mrb[17].mxu1 }
 0x108   : > { %v2628_v30 = vpack.c.bf16 %v1532_v22, %v1532_v22  ;;  %v1533_v32 = vmax.f32 %v933_v16, %v1405_v24  ;;  %v1597_v33 = vmax.f32 %v1189_v17, %v1469_v25  ;;  %2175 = vst.msk [vmem:[%s3228_s29 + $0x38] sm:$0xf] %vm2160_vm1, %v2630_v26  ;;  %v954_v38 = vadd.f32 %v2835_v34, %v3213_v3  ;;  %v2836_v46 = vpop.f32.mrb[18].mxu0  ;;  %v2900_v47 = vpop.f32.mrb[18].mxu1 }
 0x109   : > { %v2692_v31 = vpack.c.bf16 %v1596_v23, %v1596_v23  ;;  %2239 = vst.msk [vmem:[%s3228_s29 + $0x138] sm:$0xf] %vm2160_vm1, %v2694_v27  ;;  %v2631_v36 = vpack.c.bf16 %v1535_v28, %v1535_v28  ;;  %v2695_v37 = vpack.c.bf16 %v1599_v29, %v1599_v29  ;;  %v1210_v39 = vadd.f32 %v2899_v35, %v3213_v3  ;;  %v948_v52 = vpop.f32.mrb[19].mxu0  ;;  %v1204_v53 = vpop.f32.mrb[19].mxu1 }
 0x10a   : > { %2173 = vst.msk [vmem:[%s3228_s29 + $0x30] sm:$0xf] %vm2160_vm1, %v2628_v30  ;;  %v2629_v42 = vpack.c.bf16 %v1533_v32, %v1533_v32  ;;  %v2693_v43 = vpack.c.bf16 %v1597_v33, %v1597_v33  ;;  %v946_v44 = vadd.f32 %v3213_v3, %v945_v40  ;;  %v1202_v45 = vadd.f32 %v3213_v3, %v1201_v41 }
 0x10b   : > { %2237 = vst.msk [vmem:[%s3228_s29 + $0x130] sm:$0xf] %vm2160_vm1, %v2692_v31  ;;  %2176 = vst.msk [vmem:[%s3228_s29 + $0x3c] sm:$0xf] %vm2160_vm1, %v2631_v36  ;;  %v1410_v48 = vmul.f32 0.01, %v954_v38  ;;  %v957_v50 = vadd.f32 %v2836_v46, %v3213_v3  ;;  %v1213_v51 = vadd.f32 %v2900_v47, %v3213_v3  ;;  %v949_v56 = vadd.f32 %v3213_v3, %v948_v52 }
 0x10c   : > { %2240 = vst.msk [vmem:[%s3228_s29 + $0x13c] sm:$0xf] %vm2160_vm1, %v2695_v37  ;;  %v1474_v49 = vmul.f32 0.01, %v1210_v39  ;;  %2174 = vst.msk [vmem:[%s3228_s29 + $0x34] sm:$0xf] %vm2160_vm1, %v2629_v42  ;;  %v1205_v57 = vadd.f32 %v3213_v3, %v1204_v53 }
 0x10d   : > { %2238 = vst.msk [vmem:[%s3228_s29 + $0x134] sm:$0xf] %vm2160_vm1, %v2693_v43  ;;  %v1408_v54 = vmul.f32 0.01, %v946_v44  ;;  %v1472_v55 = vmul.f32 0.01, %v1202_v45  ;;  %v1538_v58 = vmax.f32 %v954_v38, %v1410_v48 }
 0x10e   : > { %v1602_v59 = vmax.f32 %v1210_v39, %v1474_v49  ;;  %v1411_v60 = vmul.f32 0.01, %v957_v50  ;;  %v1475_v61 = vmul.f32 0.01, %v1213_v51  ;;  %v1409_v0 = vmul.f32 0.01, %v949_v56 }
 0x10f   : > { %v1536_v62 = vmax.f32 %v946_v44, %v1408_v54  ;;  %v1600_v63 = vmax.f32 %v1202_v45, %v1472_v55  ;;  %v1473_v1 = vmul.f32 0.01, %v1205_v57  ;;  %v2634_v2 = vpack.c.bf16 %v1538_v58, %v1538_v58  ;;  %v2839_v11 = vpop.f32.mrb[20].mxu0  ;;  %v2903_v12 = vpop.f32.mrb[20].mxu1 }
 0x110   : > { %v2698_v4 = vpack.c.bf16 %v1602_v59, %v1602_v59  ;;  %v1539_v5 = vmax.f32 %v957_v50, %v1411_v60  ;;  %v1603_v6 = vmax.f32 %v1213_v51, %v1475_v61  ;;  %v1537_v9 = vmax.f32 %v949_v56, %v1409_v0  ;;  %v961_v17 = vpop.f32.mrb[21].mxu0  ;;  %v1217_v18 = vpop.f32.mrb[21].mxu1 }
 0x111   : > { %v2632_v7 = vpack.c.bf16 %v1536_v62, %v1536_v62  ;;  %v2696_v8 = vpack.c.bf16 %v1600_v63, %v1600_v63  ;;  %v1601_v10 = vmax.f32 %v1205_v57, %v1473_v1  ;;  %2179 = vst.msk [vmem:[%s3228_s29 + $0x48] sm:$0xf] %vm2160_vm1, %v2634_v2  ;;  %v970_v15 = vadd.f32 %v2839_v11, %v3213_v3  ;;  %v2840_v23 = vpop.f32.mrb[22].mxu0  ;;  %v2904_v24 = vpop.f32.mrb[22].mxu1 }
 0x112   : > { %2243 = vst.msk [vmem:[%s3228_s29 + $0x148] sm:$0xf] %vm2160_vm1, %v2698_v4  ;;  %v2635_v13 = vpack.c.bf16 %v1539_v5, %v1539_v5  ;;  %v2699_v14 = vpack.c.bf16 %v1603_v6, %v1603_v6  ;;  %v1226_v16 = vadd.f32 %v2903_v12, %v3213_v3  ;;  %v2633_v19 = vpack.c.bf16 %v1537_v9, %v1537_v9  ;;  %v964_v29 = vpop.f32.mrb[23].mxu0  ;;  %v1220_v30 = vpop.f32.mrb[23].mxu1 }
 0x113   : > { %2177 = vst.msk [vmem:[%s3228_s29 + $0x40] sm:$0xf] %vm2160_vm1, %v2632_v7  ;;  %2241 = vst.msk [vmem:[%s3228_s29 + $0x140] sm:$0xf] %vm2160_vm1, %v2696_v8  ;;  %v2697_v20 = vpack.c.bf16 %v1601_v10, %v1601_v10  ;;  %v962_v21 = vadd.f32 %v3213_v3, %v961_v17  ;;  %v1218_v22 = vadd.f32 %v3213_v3, %v1217_v18  ;;  %v1414_v25 = vmul.f32 0.01, %v970_v15 }
 0x114   : > { %2180 = vst.msk [vmem:[%s3228_s29 + $0x4c] sm:$0xf] %vm2160_vm1, %v2635_v13  ;;  %2244 = vst.msk [vmem:[%s3228_s29 + $0x14c] sm:$0xf] %vm2160_vm1, %v2699_v14  ;;  %v1478_v26 = vmul.f32 0.01, %v1226_v16  ;;  %v973_v27 = vadd.f32 %v2840_v23, %v3213_v3  ;;  %v1229_v28 = vadd.f32 %v2904_v24, %v3213_v3  ;;  %v965_v33 = vadd.f32 %v3213_v3, %v964_v29 }
 0x115   : > { %2178 = vst.msk [vmem:[%s3228_s29 + $0x44] sm:$0xf] %vm2160_vm1, %v2633_v19  ;;  %2242 = vst.msk [vmem:[%s3228_s29 + $0x144] sm:$0xf] %vm2160_vm1, %v2697_v20  ;;  %v1412_v31 = vmul.f32 0.01, %v962_v21  ;;  %v1221_v34 = vadd.f32 %v3213_v3, %v1220_v30  ;;  %v1542_v35 = vmax.f32 %v970_v15, %v1414_v25 }
 0x116   : > { %v1476_v32 = vmul.f32 0.01, %v1218_v22  ;;  %v1606_v36 = vmax.f32 %v1226_v16, %v1478_v26  ;;  %v1415_v37 = vmul.f32 0.01, %v973_v27  ;;  %v1479_v38 = vmul.f32 0.01, %v1229_v28 }
 0x117   : > { %v1540_v39 = vmax.f32 %v962_v21, %v1412_v31  ;;  %v1413_v41 = vmul.f32 0.01, %v965_v33  ;;  %v1477_v42 = vmul.f32 0.01, %v1221_v34  ;;  %v2638_v43 = vpack.c.bf16 %v1542_v35, %v1542_v35  ;;  %v2843_v51 = vpop.f32.mrb[24].mxu0  ;;  %v2907_v52 = vpop.f32.mrb[24].mxu1 }
 0x118   : > { %v1604_v40 = vmax.f32 %v1218_v22, %v1476_v32  ;;  %v2702_v44 = vpack.c.bf16 %v1606_v36, %v1606_v36  ;;  %v1543_v45 = vmax.f32 %v973_v27, %v1415_v37  ;;  %v1607_v46 = vmax.f32 %v1229_v28, %v1479_v38  ;;  %v977_v57 = vpop.f32.mrb[25].mxu0  ;;  %v1233_v58 = vpop.f32.mrb[25].mxu1 }
 0x119   : > { %v2636_v47 = vpack.c.bf16 %v1540_v39, %v1540_v39  ;;  %v1541_v49 = vmax.f32 %v965_v33, %v1413_v41  ;;  %v1605_v50 = vmax.f32 %v1221_v34, %v1477_v42  ;;  %2183 = vst.msk [vmem:[%s3228_s29 + $0x58] sm:$0xf] %vm2160_vm1, %v2638_v43  ;;  %v986_v55 = vadd.f32 %v2843_v51, %v3213_v3  ;;  %v2844_v63 = vpop.f32.mrb[26].mxu0  ;;  %v2908_v0 = vpop.f32.mrb[26].mxu1 }
 0x11a   : > { %v2700_v48 = vpack.c.bf16 %v1604_v40, %v1604_v40  ;;  %2247 = vst.msk [vmem:[%s3228_s29 + $0x158] sm:$0xf] %vm2160_vm1, %v2702_v44  ;;  %v2639_v53 = vpack.c.bf16 %v1543_v45, %v1543_v45  ;;  %v2703_v54 = vpack.c.bf16 %v1607_v46, %v1607_v46  ;;  %v1242_v56 = vadd.f32 %v2907_v52, %v3213_v3  ;;  %v980_v6 = vpop.f32.mrb[27].mxu0  ;;  %v1236_v7 = vpop.f32.mrb[27].mxu1 }
 0x11b   : > { %2181 = vst.msk [vmem:[%s3228_s29 + $0x50] sm:$0xf] %vm2160_vm1, %v2636_v47  ;;  %v2637_v59 = vpack.c.bf16 %v1541_v49, %v1541_v49  ;;  %v2701_v60 = vpack.c.bf16 %v1605_v50, %v1605_v50  ;;  %v978_v61 = vadd.f32 %v3213_v3, %v977_v57  ;;  %v1234_v62 = vadd.f32 %v3213_v3, %v1233_v58 }
 0x11c   : > { %2245 = vst.msk [vmem:[%s3228_s29 + $0x150] sm:$0xf] %vm2160_vm1, %v2700_v48  ;;  %2184 = vst.msk [vmem:[%s3228_s29 + $0x5c] sm:$0xf] %vm2160_vm1, %v2639_v53  ;;  %v1418_v1 = vmul.f32 0.01, %v986_v55  ;;  %v989_v4 = vadd.f32 %v2844_v63, %v3213_v3  ;;  %v1245_v5 = vadd.f32 %v2908_v0, %v3213_v3  ;;  %v981_v10 = vadd.f32 %v3213_v3, %v980_v6 }
 0x11d   : > { %2248 = vst.msk [vmem:[%s3228_s29 + $0x15c] sm:$0xf] %vm2160_vm1, %v2703_v54  ;;  %v1482_v2 = vmul.f32 0.01, %v1242_v56  ;;  %2182 = vst.msk [vmem:[%s3228_s29 + $0x54] sm:$0xf] %vm2160_vm1, %v2637_v59  ;;  %v1237_v11 = vadd.f32 %v3213_v3, %v1236_v7 }
 0x11e   : > { %2246 = vst.msk [vmem:[%s3228_s29 + $0x154] sm:$0xf] %vm2160_vm1, %v2701_v60  ;;  %v1416_v8 = vmul.f32 0.01, %v978_v61  ;;  %v1480_v9 = vmul.f32 0.01, %v1234_v62  ;;  %v1546_v12 = vmax.f32 %v986_v55, %v1418_v1 }
 0x11f   : > { %v1610_v13 = vmax.f32 %v1242_v56, %v1482_v2  ;;  %v1419_v14 = vmul.f32 0.01, %v989_v4  ;;  %v1483_v15 = vmul.f32 0.01, %v1245_v5  ;;  %v1417_v18 = vmul.f32 0.01, %v981_v10 }
 0x120   : > { %v1544_v16 = vmax.f32 %v978_v61, %v1416_v8  ;;  %v1608_v17 = vmax.f32 %v1234_v62, %v1480_v9  ;;  %v1481_v19 = vmul.f32 0.01, %v1237_v11  ;;  %v2642_v20 = vpack.c.bf16 %v1546_v12, %v1546_v12  ;;  %v2847_v28 = vpop.f32.mrb[28].mxu0  ;;  %v2911_v29 = vpop.f32.mrb[28].mxu1 }
 0x121   : > { %v2706_v21 = vpack.c.bf16 %v1610_v13, %v1610_v13  ;;  %v1547_v22 = vmax.f32 %v989_v4, %v1419_v14  ;;  %v1611_v23 = vmax.f32 %v1245_v5, %v1483_v15  ;;  %v1545_v26 = vmax.f32 %v981_v10, %v1417_v18  ;;  %v993_v34 = vpop.f32.mrb[29].mxu0  ;;  %v1249_v35 = vpop.f32.mrb[29].mxu1 }
 0x122   : > { %v2640_v24 = vpack.c.bf16 %v1544_v16, %v1544_v16  ;;  %v2704_v25 = vpack.c.bf16 %v1608_v17, %v1608_v17  ;;  %v1609_v27 = vmax.f32 %v1237_v11, %v1481_v19  ;;  %2187 = vst.msk [vmem:[%s3228_s29 + $0x68] sm:$0xf] %vm2160_vm1, %v2642_v20  ;;  %v1002_v32 = vadd.f32 %v2847_v28, %v3213_v3  ;;  %v2848_v40 = vpop.f32.mrb[30].mxu0  ;;  %v2912_v41 = vpop.f32.mrb[30].mxu1 }
 0x123   : > { %2251 = vst.msk [vmem:[%s3228_s29 + $0x168] sm:$0xf] %vm2160_vm1, %v2706_v21  ;;  %v2643_v30 = vpack.c.bf16 %v1547_v22, %v1547_v22  ;;  %v2707_v31 = vpack.c.bf16 %v1611_v23, %v1611_v23  ;;  %v1258_v33 = vadd.f32 %v2911_v29, %v3213_v3  ;;  %v2641_v36 = vpack.c.bf16 %v1545_v26, %v1545_v26  ;;  %v996_v46 = vpop.f32.mrb[31].mxu0  ;;  %v1252_v47 = vpop.f32.mrb[31].mxu1 }
 0x124   : > { %2185 = vst.msk [vmem:[%s3228_s29 + $0x60] sm:$0xf] %vm2160_vm1, %v2640_v24  ;;  %2249 = vst.msk [vmem:[%s3228_s29 + $0x160] sm:$0xf] %vm2160_vm1, %v2704_v25  ;;  %v2705_v37 = vpack.c.bf16 %v1609_v27, %v1609_v27  ;;  %v994_v38 = vadd.f32 %v3213_v3, %v993_v34  ;;  %v1250_v39 = vadd.f32 %v3213_v3, %v1249_v35  ;;  %v1422_v42 = vmul.f32 0.01, %v1002_v32 }
 0x125   : > { %2188 = vst.msk [vmem:[%s3228_s29 + $0x6c] sm:$0xf] %vm2160_vm1, %v2643_v30  ;;  %2252 = vst.msk [vmem:[%s3228_s29 + $0x16c] sm:$0xf] %vm2160_vm1, %v2707_v31  ;;  %v1486_v43 = vmul.f32 0.01, %v1258_v33  ;;  %v1005_v44 = vadd.f32 %v2848_v40, %v3213_v3  ;;  %v1261_v45 = vadd.f32 %v2912_v41, %v3213_v3  ;;  %v997_v50 = vadd.f32 %v3213_v3, %v996_v46 }
 0x126   : > { %2186 = vst.msk [vmem:[%s3228_s29 + $0x64] sm:$0xf] %vm2160_vm1, %v2641_v36  ;;  %2250 = vst.msk [vmem:[%s3228_s29 + $0x164] sm:$0xf] %vm2160_vm1, %v2705_v37  ;;  %v1420_v48 = vmul.f32 0.01, %v994_v38  ;;  %v1253_v51 = vadd.f32 %v3213_v3, %v1252_v47  ;;  %v1550_v52 = vmax.f32 %v1002_v32, %v1422_v42 }
 0x127   : > { %v1484_v49 = vmul.f32 0.01, %v1250_v39  ;;  %v1614_v53 = vmax.f32 %v1258_v33, %v1486_v43  ;;  %v1423_v54 = vmul.f32 0.01, %v1005_v44  ;;  %v1487_v55 = vmul.f32 0.01, %v1261_v45 }
 0x128   : > { %v1548_v56 = vmax.f32 %v994_v38, %v1420_v48  ;;  %v1421_v58 = vmul.f32 0.01, %v997_v50  ;;  %v1485_v59 = vmul.f32 0.01, %v1253_v51  ;;  %v2646_v60 = vpack.c.bf16 %v1550_v52, %v1550_v52  ;;  %v2851_v5 = vpop.f32.mrb[32].mxu0  ;;  %v2915_v6 = vpop.f32.mrb[32].mxu1 }
 0x129   : > { %v1612_v57 = vmax.f32 %v1250_v39, %v1484_v49  ;;  %v2710_v61 = vpack.c.bf16 %v1614_v53, %v1614_v53  ;;  %v1551_v62 = vmax.f32 %v1005_v44, %v1423_v54  ;;  %v1615_v63 = vmax.f32 %v1261_v45, %v1487_v55  ;;  %v1009_v11 = vpop.f32.mrb[33].mxu0  ;;  %v1265_v12 = vpop.f32.mrb[33].mxu1 }
 0x12a   : > { %v2644_v0 = vpack.c.bf16 %v1548_v56, %v1548_v56  ;;  %v1549_v2 = vmax.f32 %v997_v50, %v1421_v58  ;;  %v1613_v4 = vmax.f32 %v1253_v51, %v1485_v59  ;;  %2191 = vst.msk [vmem:[%s3228_s29 + $0x78] sm:$0xf] %vm2160_vm1, %v2646_v60  ;;  %v1018_v9 = vadd.f32 %v2851_v5, %v3213_v3  ;;  %v2852_v17 = vpop.f32.mrb[34].mxu0  ;;  %v2916_v18 = vpop.f32.mrb[34].mxu1 }
 0x12b   : > { %v2708_v1 = vpack.c.bf16 %v1612_v57, %v1612_v57  ;;  %2255 = vst.msk [vmem:[%s3228_s29 + $0x178] sm:$0xf] %vm2160_vm1, %v2710_v61  ;;  %v2647_v7 = vpack.c.bf16 %v1551_v62, %v1551_v62  ;;  %v2711_v8 = vpack.c.bf16 %v1615_v63, %v1615_v63  ;;  %v1274_v10 = vadd.f32 %v2915_v6, %v3213_v3  ;;  %v1012_v23 = vpop.f32.mrb[35].mxu0  ;;  %v1268_v24 = vpop.f32.mrb[35].mxu1 }
 0x12c   : > { %2189 = vst.msk [vmem:[%s3228_s29 + $0x70] sm:$0xf] %vm2160_vm1, %v2644_v0  ;;  %v2645_v13 = vpack.c.bf16 %v1549_v2, %v1549_v2  ;;  %v2709_v14 = vpack.c.bf16 %v1613_v4, %v1613_v4  ;;  %v1010_v15 = vadd.f32 %v3213_v3, %v1009_v11  ;;  %v1266_v16 = vadd.f32 %v3213_v3, %v1265_v12 }
 0x12d   : > { %2253 = vst.msk [vmem:[%s3228_s29 + $0x170] sm:$0xf] %vm2160_vm1, %v2708_v1  ;;  %2192 = vst.msk [vmem:[%s3228_s29 + $0x7c] sm:$0xf] %vm2160_vm1, %v2647_v7  ;;  %v1426_v19 = vmul.f32 0.01, %v1018_v9  ;;  %v1021_v21 = vadd.f32 %v2852_v17, %v3213_v3  ;;  %v1277_v22 = vadd.f32 %v2916_v18, %v3213_v3  ;;  %v1013_v27 = vadd.f32 %v3213_v3, %v1012_v23 }
 0x12e   : > { %2256 = vst.msk [vmem:[%s3228_s29 + $0x17c] sm:$0xf] %vm2160_vm1, %v2711_v8  ;;  %v1490_v20 = vmul.f32 0.01, %v1274_v10  ;;  %2190 = vst.msk [vmem:[%s3228_s29 + $0x74] sm:$0xf] %vm2160_vm1, %v2645_v13  ;;  %v1269_v28 = vadd.f32 %v3213_v3, %v1268_v24 }
 0x12f   : > { %2254 = vst.msk [vmem:[%s3228_s29 + $0x174] sm:$0xf] %vm2160_vm1, %v2709_v14  ;;  %v1424_v25 = vmul.f32 0.01, %v1010_v15  ;;  %v1488_v26 = vmul.f32 0.01, %v1266_v16  ;;  %v1554_v29 = vmax.f32 %v1018_v9, %v1426_v19 }
 0x130   : > { %v1618_v30 = vmax.f32 %v1274_v10, %v1490_v20  ;;  %v1427_v31 = vmul.f32 0.01, %v1021_v21  ;;  %v1491_v32 = vmul.f32 0.01, %v1277_v22  ;;  %v1425_v35 = vmul.f32 0.01, %v1013_v27 }
 0x131   : > { %v1552_v33 = vmax.f32 %v1010_v15, %v1424_v25  ;;  %v1616_v34 = vmax.f32 %v1266_v16, %v1488_v26  ;;  %v1489_v36 = vmul.f32 0.01, %v1269_v28  ;;  %v2650_v37 = vpack.c.bf16 %v1554_v29, %v1554_v29  ;;  %v2855_v45 = vpop.f32.mrb[36].mxu0  ;;  %v2919_v46 = vpop.f32.mrb[36].mxu1 }
 0x132   : > { %v2714_v38 = vpack.c.bf16 %v1618_v30, %v1618_v30  ;;  %v1555_v39 = vmax.f32 %v1021_v21, %v1427_v31  ;;  %v1619_v40 = vmax.f32 %v1277_v22, %v1491_v32  ;;  %v1553_v43 = vmax.f32 %v1013_v27, %v1425_v35  ;;  %v1025_v51 = vpop.f32.mrb[37].mxu0  ;;  %v1281_v52 = vpop.f32.mrb[37].mxu1 }
 0x133   : > { %v2648_v41 = vpack.c.bf16 %v1552_v33, %v1552_v33  ;;  %v2712_v42 = vpack.c.bf16 %v1616_v34, %v1616_v34  ;;  %v1617_v44 = vmax.f32 %v1269_v28, %v1489_v36  ;;  %2195 = vst.msk [vmem:[%s3228_s29 + $0x88] sm:$0xf] %vm2160_vm1, %v2650_v37  ;;  %v1034_v49 = vadd.f32 %v2855_v45, %v3213_v3  ;;  %v2856_v57 = vpop.f32.mrb[38].mxu0  ;;  %v2920_v58 = vpop.f32.mrb[38].mxu1 }
 0x134   : > { %2259 = vst.msk [vmem:[%s3228_s29 + $0x188] sm:$0xf] %vm2160_vm1, %v2714_v38  ;;  %v2651_v47 = vpack.c.bf16 %v1555_v39, %v1555_v39  ;;  %v2715_v48 = vpack.c.bf16 %v1619_v40, %v1619_v40  ;;  %v1290_v50 = vadd.f32 %v2919_v46, %v3213_v3  ;;  %v2649_v53 = vpack.c.bf16 %v1553_v43, %v1553_v43  ;;  %v1028_v63 = vpop.f32.mrb[39].mxu0  ;;  %v1284_v0 = vpop.f32.mrb[39].mxu1 }
 0x135   : > { %2193 = vst.msk [vmem:[%s3228_s29 + $0x80] sm:$0xf] %vm2160_vm1, %v2648_v41  ;;  %2257 = vst.msk [vmem:[%s3228_s29 + $0x180] sm:$0xf] %vm2160_vm1, %v2712_v42  ;;  %v2713_v54 = vpack.c.bf16 %v1617_v44, %v1617_v44  ;;  %v1026_v55 = vadd.f32 %v3213_v3, %v1025_v51  ;;  %v1282_v56 = vadd.f32 %v3213_v3, %v1281_v52  ;;  %v1430_v59 = vmul.f32 0.01, %v1034_v49 }
 0x136   : > { %2196 = vst.msk [vmem:[%s3228_s29 + $0x8c] sm:$0xf] %vm2160_vm1, %v2651_v47  ;;  %2260 = vst.msk [vmem:[%s3228_s29 + $0x18c] sm:$0xf] %vm2160_vm1, %v2715_v48  ;;  %v1494_v60 = vmul.f32 0.01, %v1290_v50  ;;  %v1037_v61 = vadd.f32 %v2856_v57, %v3213_v3  ;;  %v1293_v62 = vadd.f32 %v2920_v58, %v3213_v3  ;;  %v1029_v4 = vadd.f32 %v3213_v3, %v1028_v63 }
 0x137   : > { %2194 = vst.msk [vmem:[%s3228_s29 + $0x84] sm:$0xf] %vm2160_vm1, %v2649_v53  ;;  %2258 = vst.msk [vmem:[%s3228_s29 + $0x184] sm:$0xf] %vm2160_vm1, %v2713_v54  ;;  %v1428_v1 = vmul.f32 0.01, %v1026_v55  ;;  %v1285_v5 = vadd.f32 %v3213_v3, %v1284_v0  ;;  %v1558_v6 = vmax.f32 %v1034_v49, %v1430_v59 }
 0x138   : > { %v1492_v2 = vmul.f32 0.01, %v1282_v56  ;;  %v1622_v7 = vmax.f32 %v1290_v50, %v1494_v60  ;;  %v1431_v8 = vmul.f32 0.01, %v1037_v61  ;;  %v1495_v9 = vmul.f32 0.01, %v1293_v62 }
 0x139   : > { %v1556_v10 = vmax.f32 %v1026_v55, %v1428_v1  ;;  %v1429_v12 = vmul.f32 0.01, %v1029_v4  ;;  %v1493_v13 = vmul.f32 0.01, %v1285_v5  ;;  %v2654_v14 = vpack.c.bf16 %v1558_v6, %v1558_v6  ;;  %v2859_v22 = vpop.f32.mrb[40].mxu0  ;;  %v2923_v23 = vpop.f32.mrb[40].mxu1 }
 0x13a   : > { %v1620_v11 = vmax.f32 %v1282_v56, %v1492_v2  ;;  %v2718_v15 = vpack.c.bf16 %v1622_v7, %v1622_v7  ;;  %v1559_v16 = vmax.f32 %v1037_v61, %v1431_v8  ;;  %v1623_v17 = vmax.f32 %v1293_v62, %v1495_v9  ;;  %v1041_v28 = vpop.f32.mrb[41].mxu0  ;;  %v1297_v29 = vpop.f32.mrb[41].mxu1  ;;  %v3477_v1 = vld [vmem:[%s3616_s2] ss:$0 sm:$0xff] }
 0x13b   : > { %v2652_v18 = vpack.c.bf16 %v1556_v10, %v1556_v10  ;;  %v1557_v20 = vmax.f32 %v1029_v4, %v1429_v12  ;;  %v1621_v21 = vmax.f32 %v1285_v5, %v1493_v13  ;;  %2199 = vst.msk [vmem:[%s3228_s29 + $0x98] sm:$0xf] %vm2160_vm1, %v2654_v14  ;;  %v1050_v26 = vadd.f32 %v2859_v22, %v3213_v3  ;;  %v2860_v34 = vpop.f32.mrb[42].mxu0  ;;  %v2924_v35 = vpop.f32.mrb[42].mxu1 }
 0x13c   : > { %v2716_v19 = vpack.c.bf16 %v1620_v11, %v1620_v11  ;;  %2263 = vst.msk [vmem:[%s3228_s29 + $0x198] sm:$0xf] %vm2160_vm1, %v2718_v15  ;;  %v2655_v24 = vpack.c.bf16 %v1559_v16, %v1559_v16  ;;  %v2719_v25 = vpack.c.bf16 %v1623_v17, %v1623_v17  ;;  %v1306_v27 = vadd.f32 %v2923_v23, %v3213_v3  ;;  %v1044_v40 = vpop.f32.mrb[43].mxu0  ;;  %v1300_v41 = vpop.f32.mrb[43].mxu1 }
 0x13d   : > { %2197 = vst.msk [vmem:[%s3228_s29 + $0x90] sm:$0xf] %vm2160_vm1, %v2652_v18  ;;  %v2653_v30 = vpack.c.bf16 %v1557_v20, %v1557_v20  ;;  %v2717_v31 = vpack.c.bf16 %v1621_v21, %v1621_v21  ;;  %v1042_v32 = vadd.f32 %v3213_v3, %v1041_v28  ;;  %v1298_v33 = vadd.f32 %v3213_v3, %v1297_v29  ;;  %v2863_v61 = vpop.f32.mrb[44].mxu0 }
 0x13e   : > { %2261 = vst.msk [vmem:[%s3228_s29 + $0x190] sm:$0xf] %vm2160_vm1, %v2716_v19  ;;  %2200 = vst.msk [vmem:[%s3228_s29 + $0x9c] sm:$0xf] %vm2160_vm1, %v2655_v24  ;;  %v1434_v36 = vmul.f32 0.01, %v1050_v26  ;;  %v1053_v38 = vadd.f32 %v2860_v34, %v3213_v3  ;;  %v1309_v39 = vadd.f32 %v2924_v35, %v3213_v3  ;;  %v1045_v44 = vadd.f32 %v3213_v3, %v1044_v40 }
 0x13f   : > { %2264 = vst.msk [vmem:[%s3228_s29 + $0x19c] sm:$0xf] %vm2160_vm1, %v2719_v25  ;;  %v1498_v37 = vmul.f32 0.01, %v1306_v27  ;;  %2198 = vst.msk [vmem:[%s3228_s29 + $0x94] sm:$0xf] %vm2160_vm1, %v2653_v30  ;;  %v1301_v45 = vadd.f32 %v3213_v3, %v1300_v41  ;;  %v1066_v2 = vadd.f32 %v3477_v1, %v2863_v61 }
 0x140   : > { %2262 = vst.msk [vmem:[%s3228_s29 + $0x194] sm:$0xf] %vm2160_vm1, %v2717_v31  ;;  %v1432_v42 = vmul.f32 0.01, %v1042_v32  ;;  %v1496_v43 = vmul.f32 0.01, %v1298_v33  ;;  %v1562_v46 = vmax.f32 %v1050_v26, %v1434_v36 }
 0x141   : > { %v1626_v47 = vmax.f32 %v1306_v27, %v1498_v37  ;;  %v1435_v48 = vmul.f32 0.01, %v1053_v38  ;;  %v1499_v49 = vmul.f32 0.01, %v1309_v39  ;;  %v1433_v52 = vmul.f32 0.01, %v1045_v44 }
 0x142   : > { %v1560_v50 = vmax.f32 %v1042_v32, %v1432_v42  ;;  %v1624_v51 = vmax.f32 %v1298_v33, %v1496_v43  ;;  %v1497_v53 = vmul.f32 0.01, %v1301_v45  ;;  %v2658_v54 = vpack.c.bf16 %v1562_v46, %v1562_v46  ;;  %v2927_v62 = vpop.f32.mrb[44].mxu1  ;;  %v1057_v5 = vpop.f32.mrb[45].mxu0 }
 0x143   : > { %v2722_v55 = vpack.c.bf16 %v1626_v47, %v1626_v47  ;;  %v1563_v56 = vmax.f32 %v1053_v38, %v1435_v48  ;;  %v1627_v57 = vmax.f32 %v1309_v39, %v1499_v49  ;;  %v1561_v60 = vmax.f32 %v1045_v44, %v1433_v52  ;;  %v1313_v6 = vpop.f32.mrb[45].mxu1  ;;  %v2864_v11 = vpop.f32.mrb[46].mxu0 }
 0x144   : > { %v2656_v58 = vpack.c.bf16 %v1560_v50, %v1560_v50  ;;  %v2720_v59 = vpack.c.bf16 %v1624_v51, %v1624_v51  ;;  %v1625_v3 = vmax.f32 %v1301_v45, %v1497_v53  ;;  %2203 = vst.msk [vmem:[%s3228_s29 + $0xa8] sm:$0xf] %vm2160_vm1, %v2658_v54  ;;  %v1322_v4 = vadd.f32 %v3477_v1, %v2927_v62  ;;  %v2928_v12 = vpop.f32.mrb[46].mxu1  ;;  %v1060_v17 = vpop.f32.mrb[47].mxu0 }
 0x145   : > { %2267 = vst.msk [vmem:[%s3228_s29 + $0x1a8] sm:$0xf] %vm2160_vm1, %v2722_v55  ;;  %v2659_v63 = vpack.c.bf16 %v1563_v56, %v1563_v56  ;;  %v2723_v0 = vpack.c.bf16 %v1627_v57, %v1627_v57  ;;  %v2657_v7 = vpack.c.bf16 %v1561_v60, %v1561_v60  ;;  %v1058_v9 = vadd.f32 %v3477_v1, %v1057_v5  ;;  %v1316_v18 = vpop.f32.mrb[47].mxu1  ;;  %v2867_v39 = vpop.f32.mrb[48].mxu0 }
 0x146   : > { %2201 = vst.msk [vmem:[%s3228_s29 + $0xa0] sm:$0xf] %vm2160_vm1, %v2656_v58  ;;  %2265 = vst.msk [vmem:[%s3228_s29 + $0x1a0] sm:$0xf] %vm2160_vm1, %v2720_v59  ;;  %v2721_v8 = vpack.c.bf16 %v1625_v3, %v1625_v3  ;;  %v1314_v10 = vadd.f32 %v3477_v1, %v1313_v6  ;;  %v1438_v13 = vmul.f32 0.01, %v1066_v2  ;;  %v1069_v15 = vadd.f32 %v3477_v1, %v2864_v11 }
 0x147   : > { %2204 = vst.msk [vmem:[%s3228_s29 + $0xac] sm:$0xf] %vm2160_vm1, %v2659_v63  ;;  %2268 = vst.msk [vmem:[%s3228_s29 + $0x1ac] sm:$0xf] %vm2160_vm1, %v2723_v0  ;;  %v1502_v14 = vmul.f32 0.01, %v1322_v4  ;;  %v1325_v16 = vadd.f32 %v3477_v1, %v2928_v12  ;;  %v1061_v21 = vadd.f32 %v3477_v1, %v1060_v17  ;;  %v1317_v22 = vadd.f32 %v3477_v1, %v1316_v18 }
 0x148   : > { %2202 = vst.msk [vmem:[%s3228_s29 + $0xa4] sm:$0xf] %vm2160_vm1, %v2657_v7  ;;  %2266 = vst.msk [vmem:[%s3228_s29 + $0x1a4] sm:$0xf] %vm2160_vm1, %v2721_v8  ;;  %v1436_v19 = vmul.f32 0.01, %v1058_v9  ;;  %v1566_v23 = vmax.f32 %v1066_v2, %v1438_v13  ;;  %v1082_v43 = vadd.f32 %v3477_v1, %v2867_v39 }
 0x149   : > { %v1500_v20 = vmul.f32 0.01, %v1314_v10  ;;  %v1630_v24 = vmax.f32 %v1322_v4, %v1502_v14  ;;  %v1439_v25 = vmul.f32 0.01, %v1069_v15  ;;  %v1503_v26 = vmul.f32 0.01, %v1325_v16 }
 0x14a   : > { %v1564_v27 = vmax.f32 %v1058_v9, %v1436_v19  ;;  %v1437_v29 = vmul.f32 0.01, %v1061_v21  ;;  %v1501_v30 = vmul.f32 0.01, %v1317_v22  ;;  %v2662_v31 = vpack.c.bf16 %v1566_v23, %v1566_v23  ;;  %v2931_v40 = vpop.f32.mrb[48].mxu1  ;;  %v1073_v45 = vpop.f32.mrb[49].mxu0 }
 0x14b   : > { %v1628_v28 = vmax.f32 %v1314_v10, %v1500_v20  ;;  %v2726_v32 = vpack.c.bf16 %v1630_v24, %v1630_v24  ;;  %v1567_v33 = vmax.f32 %v1069_v15, %v1439_v25  ;;  %v1631_v34 = vmax.f32 %v1325_v16, %v1503_v26  ;;  %v1329_v46 = vpop.f32.mrb[49].mxu1  ;;  %v2868_v51 = vpop.f32.mrb[50].mxu0 }
 0x14c   : > { %v2660_v35 = vpack.c.bf16 %v1564_v27, %v1564_v27  ;;  %v1565_v37 = vmax.f32 %v1061_v21, %v1437_v29  ;;  %v1629_v38 = vmax.f32 %v1317_v22, %v1501_v30  ;;  %2207 = vst.msk [vmem:[%s3228_s29 + $0xb8] sm:$0xf] %vm2160_vm1, %v2662_v31  ;;  %v1338_v44 = vadd.f32 %v3477_v1, %v2931_v40  ;;  %v2932_v52 = vpop.f32.mrb[50].mxu1  ;;  %v1076_v57 = vpop.f32.mrb[51].mxu0 }
 0x14d   : > { %v2724_v36 = vpack.c.bf16 %v1628_v28, %v1628_v28  ;;  %2271 = vst.msk [vmem:[%s3228_s29 + $0x1b8] sm:$0xf] %vm2160_vm1, %v2726_v32  ;;  %v2663_v41 = vpack.c.bf16 %v1567_v33, %v1567_v33  ;;  %v2727_v42 = vpack.c.bf16 %v1631_v34, %v1631_v34  ;;  %v1074_v49 = vadd.f32 %v3477_v1, %v1073_v45  ;;  %v1332_v58 = vpop.f32.mrb[51].mxu1  ;;  %v2871_v16 = vpop.f32.mrb[52].mxu0 }
 0x14e   : > { %2205 = vst.msk [vmem:[%s3228_s29 + $0xb0] sm:$0xf] %vm2160_vm1, %v2660_v35  ;;  %v2661_v47 = vpack.c.bf16 %v1565_v37, %v1565_v37  ;;  %v2725_v48 = vpack.c.bf16 %v1629_v38, %v1629_v38  ;;  %v1330_v50 = vadd.f32 %v3477_v1, %v1329_v46  ;;  %v1442_v53 = vmul.f32 0.01, %v1082_v43  ;;  %v2935_v17 = vpop.f32.mrb[52].mxu1  ;;  %v1089_v22 = vpop.f32.mrb[53].mxu0 }
 0x14f   : > { %2269 = vst.msk [vmem:[%s3228_s29 + $0x1b0] sm:$0xf] %vm2160_vm1, %v2724_v36  ;;  %2208 = vst.msk [vmem:[%s3228_s29 + $0xbc] sm:$0xf] %vm2160_vm1, %v2663_v41  ;;  %v1506_v54 = vmul.f32 0.01, %v1338_v44  ;;  %v1085_v55 = vadd.f32 %v3477_v1, %v2868_v51  ;;  %v1341_v56 = vadd.f32 %v3477_v1, %v2932_v52  ;;  %v1077_v3 = vadd.f32 %v3477_v1, %v1076_v57 }
 0x150   : > { %2272 = vst.msk [vmem:[%s3228_s29 + $0x1bc] sm:$0xf] %vm2160_vm1, %v2727_v42  ;;  %2206 = vst.msk [vmem:[%s3228_s29 + $0xb4] sm:$0xf] %vm2160_vm1, %v2661_v47  ;;  %v1440_v59 = vmul.f32 0.01, %v1074_v49  ;;  %v1333_v61 = vadd.f32 %v3477_v1, %v1332_v58  ;;  %v1570_v62 = vmax.f32 %v1082_v43, %v1442_v53  ;;  %v1098_v20 = vadd.f32 %v3477_v1, %v2871_v16 }
 0x151   : > { %2270 = vst.msk [vmem:[%s3228_s29 + $0x1b4] sm:$0xf] %vm2160_vm1, %v2725_v48  ;;  %v1504_v60 = vmul.f32 0.01, %v1330_v50  ;;  %v1634_v63 = vmax.f32 %v1338_v44, %v1506_v54  ;;  %v1443_v0 = vmul.f32 0.01, %v1085_v55  ;;  %v1354_v21 = vadd.f32 %v3477_v1, %v2935_v17 }
 0x152   : > { %v1507_v2 = vmul.f32 0.01, %v1341_v56  ;;  %v1568_v4 = vmax.f32 %v1074_v49, %v1440_v59  ;;  %v1441_v6 = vmul.f32 0.01, %v1077_v3  ;;  %v1505_v7 = vmul.f32 0.01, %v1333_v61 }
 0x153   : > { %v1632_v5 = vmax.f32 %v1330_v50, %v1504_v60  ;;  %v2666_v8 = vpack.c.bf16 %v1570_v62, %v1570_v62  ;;  %v2730_v9 = vpack.c.bf16 %v1634_v63, %v1634_v63  ;;  %v1571_v10 = vmax.f32 %v1085_v55, %v1443_v0  ;;  %v1345_v23 = vpop.f32.mrb[53].mxu1  ;;  %v2872_v28 = vpop.f32.mrb[54].mxu0 }
 0x154   : > { %v1635_v11 = vmax.f32 %v1341_v56, %v1507_v2  ;;  %v2664_v12 = vpack.c.bf16 %v1568_v4, %v1568_v4  ;;  %v1569_v14 = vmax.f32 %v1077_v3, %v1441_v6  ;;  %v1633_v15 = vmax.f32 %v1333_v61, %v1505_v7  ;;  %v2936_v29 = vpop.f32.mrb[54].mxu1  ;;  %v1092_v34 = vpop.f32.mrb[55].mxu0 }
 0x155   : > { %v2728_v13 = vpack.c.bf16 %v1632_v5, %v1632_v5  ;;  %2211 = vst.msk [vmem:[%s3228_s29 + $0xc8] sm:$0xf] %vm2160_vm1, %v2666_v8  ;;  %2275 = vst.msk [vmem:[%s3228_s29 + $0x1c8] sm:$0xf] %vm2160_vm1, %v2730_v9  ;;  %v2667_v18 = vpack.c.bf16 %v1571_v10, %v1571_v10  ;;  %v1090_v26 = vadd.f32 %v3477_v1, %v1089_v22  ;;  %v1446_v30 = vmul.f32 0.01, %v1098_v20 }
 0x156   : > { %v2731_v19 = vpack.c.bf16 %v1635_v11, %v1635_v11  ;;  %2209 = vst.msk [vmem:[%s3228_s29 + $0xc0] sm:$0xf] %vm2160_vm1, %v2664_v12  ;;  %v2665_v24 = vpack.c.bf16 %v1569_v14, %v1569_v14  ;;  %v2729_v25 = vpack.c.bf16 %v1633_v15, %v1633_v15  ;;  %v1346_v27 = vadd.f32 %v3477_v1, %v1345_v23  ;;  %v1348_v35 = vpop.f32.mrb[55].mxu1  ;;  %v2875_v56 = vpop.f32.mrb[56].mxu0 }
 0x157   : > { %2273 = vst.msk [vmem:[%s3228_s29 + $0x1c0] sm:$0xf] %vm2160_vm1, %v2728_v13  ;;  %2212 = vst.msk [vmem:[%s3228_s29 + $0xcc] sm:$0xf] %vm2160_vm1, %v2667_v18  ;;  %v1510_v31 = vmul.f32 0.01, %v1354_v21  ;;  %v1101_v32 = vadd.f32 %v3477_v1, %v2872_v28  ;;  %v1357_v33 = vadd.f32 %v3477_v1, %v2936_v29  ;;  %v1093_v38 = vadd.f32 %v3477_v1, %v1092_v34 }
 0x158   : > { %2276 = vst.msk [vmem:[%s3228_s29 + $0x1cc] sm:$0xf] %vm2160_vm1, %v2731_v19  ;;  %2210 = vst.msk [vmem:[%s3228_s29 + $0xc4] sm:$0xf] %vm2160_vm1, %v2665_v24  ;;  %v1444_v36 = vmul.f32 0.01, %v1090_v26  ;;  %v1349_v39 = vadd.f32 %v3477_v1, %v1348_v35  ;;  %v1574_v40 = vmax.f32 %v1098_v20, %v1446_v30  ;;  %v1114_v60 = vadd.f32 %v3477_v1, %v2875_v56 }
 0x159   : > { %2274 = vst.msk [vmem:[%s3228_s29 + $0x1c4] sm:$0xf] %vm2160_vm1, %v2729_v25  ;;  %v1508_v37 = vmul.f32 0.01, %v1346_v27  ;;  %v1638_v41 = vmax.f32 %v1354_v21, %v1510_v31  ;;  %v1447_v42 = vmul.f32 0.01, %v1101_v32 }
 0x15a   : > { %v1511_v43 = vmul.f32 0.01, %v1357_v33  ;;  %v1572_v44 = vmax.f32 %v1090_v26, %v1444_v36  ;;  %v1445_v46 = vmul.f32 0.01, %v1093_v38  ;;  %v1509_v47 = vmul.f32 0.01, %v1349_v39 }
 0x15b   : > { %v1636_v45 = vmax.f32 %v1346_v27, %v1508_v37  ;;  %v2670_v48 = vpack.c.bf16 %v1574_v40, %v1574_v40  ;;  %v2734_v49 = vpack.c.bf16 %v1638_v41, %v1638_v41  ;;  %v1575_v50 = vmax.f32 %v1101_v32, %v1447_v42  ;;  %v2939_v57 = vpop.f32.mrb[56].mxu1  ;;  %v1105_v61 = vpop.f32.mrb[57].mxu0 }
 0x15c   : > { %v1639_v51 = vmax.f32 %v1357_v33, %v1511_v43  ;;  %v2668_v52 = vpack.c.bf16 %v1572_v44, %v1572_v44  ;;  %v1573_v54 = vmax.f32 %v1093_v38, %v1445_v46  ;;  %v1637_v55 = vmax.f32 %v1349_v39, %v1509_v47  ;;  %v1361_v62 = vpop.f32.mrb[57].mxu1  ;;  %v2876_v5 = vpop.f32.mrb[58].mxu0 }
 0x15d   : > { %v2732_v53 = vpack.c.bf16 %v1636_v45, %v1636_v45  ;;  %2215 = vst.msk [vmem:[%s3228_s29 + $0xd8] sm:$0xf] %vm2160_vm1, %v2670_v48  ;;  %2279 = vst.msk [vmem:[%s3228_s29 + $0x1d8] sm:$0xf] %vm2160_vm1, %v2734_v49  ;;  %v2671_v58 = vpack.c.bf16 %v1575_v50, %v1575_v50  ;;  %v1370_v3 = vadd.f32 %v3477_v1, %v2939_v57  ;;  %v2940_v6 = vpop.f32.mrb[58].mxu1  ;;  %v1108_v11 = vpop.f32.mrb[59].mxu0 }
 0x15e   : > { %v2735_v59 = vpack.c.bf16 %v1639_v51, %v1639_v51  ;;  %2213 = vst.msk [vmem:[%s3228_s29 + $0xd0] sm:$0xf] %vm2160_vm1, %v2668_v52  ;;  %v2669_v63 = vpack.c.bf16 %v1573_v54, %v1573_v54  ;;  %v2733_v0 = vpack.c.bf16 %v1637_v55, %v1637_v55  ;;  %v1106_v2 = vadd.f32 %v3477_v1, %v1105_v61  ;;  %v1364_v12 = vpop.f32.mrb[59].mxu1  ;;  %v2879_v33 = vpop.f32.mrb[60].mxu0 }
 0x15f   : > { %2277 = vst.msk [vmem:[%s3228_s29 + $0x1d0] sm:$0xf] %vm2160_vm1, %v2732_v53  ;;  %v1362_v4 = vadd.f32 %v3477_v1, %v1361_v62  ;;  %2216 = vst.msk [vmem:[%s3228_s29 + $0xdc] sm:$0xf] %vm2160_vm1, %v2671_v58  ;;  %v1450_v7 = vmul.f32 0.01, %v1114_v60  ;;  %v1117_v9 = vadd.f32 %v3477_v1, %v2876_v5  ;;  %v1373_v10 = vadd.f32 %v3477_v1, %v2940_v6 }
 0x160   : > { %2280 = vst.msk [vmem:[%s3228_s29 + $0x1dc] sm:$0xf] %vm2160_vm1, %v2735_v59  ;;  %v1514_v8 = vmul.f32 0.01, %v1370_v3  ;;  %2214 = vst.msk [vmem:[%s3228_s29 + $0xd4] sm:$0xf] %vm2160_vm1, %v2669_v63  ;;  %v1109_v15 = vadd.f32 %v3477_v1, %v1108_v11  ;;  %v1365_v16 = vadd.f32 %v3477_v1, %v1364_v12  ;;  %v1130_v37 = vadd.f32 %v3477_v1, %v2879_v33 }
 0x161   : > { %2278 = vst.msk [vmem:[%s3228_s29 + $0x1d4] sm:$0xf] %vm2160_vm1, %v2733_v0  ;;  %v1448_v13 = vmul.f32 0.01, %v1106_v2  ;;  %v1512_v14 = vmul.f32 0.01, %v1362_v4  ;;  %v1578_v17 = vmax.f32 %v1114_v60, %v1450_v7 }
 0x162   : > { %v1642_v18 = vmax.f32 %v1370_v3, %v1514_v8  ;;  %v1451_v19 = vmul.f32 0.01, %v1117_v9  ;;  %v1515_v20 = vmul.f32 0.01, %v1373_v10  ;;  %v1449_v23 = vmul.f32 0.01, %v1109_v15 }
 0x163   : > { %v1576_v21 = vmax.f32 %v1106_v2, %v1448_v13  ;;  %v1640_v22 = vmax.f32 %v1362_v4, %v1512_v14  ;;  %v1513_v24 = vmul.f32 0.01, %v1365_v16  ;;  %v2674_v25 = vpack.c.bf16 %v1578_v17, %v1578_v17  ;;  %v2943_v34 = vpop.f32.mrb[60].mxu1  ;;  %v1121_v39 = vpop.f32.mrb[61].mxu0 }
 0x164   : > { %v2738_v26 = vpack.c.bf16 %v1642_v18, %v1642_v18  ;;  %v1579_v27 = vmax.f32 %v1117_v9, %v1451_v19  ;;  %v1643_v28 = vmax.f32 %v1373_v10, %v1515_v20  ;;  %v1577_v31 = vmax.f32 %v1109_v15, %v1449_v23  ;;  %v1377_v40 = vpop.f32.mrb[61].mxu1  ;;  %v2880_v45 = vpop.f32.mrb[62].mxu0 }
 0x165   : > { %v2672_v29 = vpack.c.bf16 %v1576_v21, %v1576_v21  ;;  %v2736_v30 = vpack.c.bf16 %v1640_v22, %v1640_v22  ;;  %v1641_v32 = vmax.f32 %v1365_v16, %v1513_v24  ;;  %2219 = vst.msk [vmem:[%s3228_s29 + $0xe8] sm:$0xf] %vm2160_vm1, %v2674_v25  ;;  %v1386_v38 = vadd.f32 %v3477_v1, %v2943_v34  ;;  %v2944_v46 = vpop.f32.mrb[62].mxu1  ;;  %v1124_v51 = vpop.f32.mrb[63].mxu0 }
 0x166   : > { %2283 = vst.msk [vmem:[%s3228_s29 + $0x1e8] sm:$0xf] %vm2160_vm1, %v2738_v26  ;;  %v2675_v35 = vpack.c.bf16 %v1579_v27, %v1579_v27  ;;  %v2739_v36 = vpack.c.bf16 %v1643_v28, %v1643_v28  ;;  %v2673_v41 = vpack.c.bf16 %v1577_v31, %v1577_v31  ;;  %v1122_v43 = vadd.f32 %v3477_v1, %v1121_v39  ;;  %v1380_v52 = vpop.f32.mrb[63].mxu1 }
 0x167   : > { %2217 = vst.msk [vmem:[%s3228_s29 + $0xe0] sm:$0xf] %vm2160_vm1, %v2672_v29  ;;  %2281 = vst.msk [vmem:[%s3228_s29 + $0x1e0] sm:$0xf] %vm2160_vm1, %v2736_v30  ;;  %v2737_v42 = vpack.c.bf16 %v1641_v32, %v1641_v32  ;;  %v1378_v44 = vadd.f32 %v3477_v1, %v1377_v40  ;;  %v1454_v47 = vmul.f32 0.01, %v1130_v37  ;;  %v1133_v49 = vadd.f32 %v3477_v1, %v2880_v45 }
 0x168   : > { %2220 = vst.msk [vmem:[%s3228_s29 + $0xec] sm:$0xf] %vm2160_vm1, %v2675_v35  ;;  %2284 = vst.msk [vmem:[%s3228_s29 + $0x1ec] sm:$0xf] %vm2160_vm1, %v2739_v36  ;;  %v1518_v48 = vmul.f32 0.01, %v1386_v38  ;;  %v1389_v50 = vadd.f32 %v3477_v1, %v2944_v46  ;;  %v1125_v55 = vadd.f32 %v3477_v1, %v1124_v51  ;;  %v1381_v56 = vadd.f32 %v3477_v1, %v1380_v52 }
 0x169   : > { %2218 = vst.msk [vmem:[%s3228_s29 + $0xe4] sm:$0xf] %vm2160_vm1, %v2673_v41  ;;  %2282 = vst.msk [vmem:[%s3228_s29 + $0x1e4] sm:$0xf] %vm2160_vm1, %v2737_v42  ;;  %v1452_v53 = vmul.f32 0.01, %v1122_v43  ;;  %v1582_v57 = vmax.f32 %v1130_v37, %v1454_v47 }
 0x16a   : > { %v1516_v54 = vmul.f32 0.01, %v1378_v44  ;;  %v1646_v58 = vmax.f32 %v1386_v38, %v1518_v48  ;;  %v1455_v59 = vmul.f32 0.01, %v1133_v49  ;;  %v1519_v60 = vmul.f32 0.01, %v1389_v50 }
 0x16b   : > { %v1580_v3 = vmax.f32 %v1122_v43, %v1452_v53  ;;  %v1453_v62 = vmul.f32 0.01, %v1125_v55  ;;  %v1517_v63 = vmul.f32 0.01, %v1381_v56  ;;  %v2678_v0 = vpack.c.bf16 %v1582_v57, %v1582_v57 }
 0x16c   : > { %v1644_v61 = vmax.f32 %v1378_v44, %v1516_v54  ;;  %v2742_v2 = vpack.c.bf16 %v1646_v58, %v1646_v58  ;;  %v1583_v4 = vmax.f32 %v1133_v49, %v1455_v59  ;;  %v1647_v5 = vmax.f32 %v1389_v50, %v1519_v60 }
 0x16d   : > { %v2676_v1 = vpack.c.bf16 %v1580_v3, %v1580_v3  ;;  %v1581_v7 = vmax.f32 %v1125_v55, %v1453_v62  ;;  %v1645_v8 = vmax.f32 %v1381_v56, %v1517_v63  ;;  %2223 = vst.msk [vmem:[%s3228_s29 + $0xf8] sm:$0xf] %vm2160_vm1, %v2678_v0 }
 0x16e   : > { %v2740_v6 = vpack.c.bf16 %v1644_v61, %v1644_v61  ;;  %2287 = vst.msk [vmem:[%s3228_s29 + $0x1f8] sm:$0xf] %vm2160_vm1, %v2742_v2  ;;  %v2679_v9 = vpack.c.bf16 %v1583_v4, %v1583_v4  ;;  %v2743_v10 = vpack.c.bf16 %v1647_v5, %v1647_v5 }
 0x16f   : > { %2221 = vst.msk [vmem:[%s3228_s29 + $0xf0] sm:$0xf] %vm2160_vm1, %v2676_v1  ;;  %v2677_v11 = vpack.c.bf16 %v1581_v7, %v1581_v7  ;;  %v2741_v12 = vpack.c.bf16 %v1645_v8, %v1645_v8 }
 0x170   : > { %2285 = vst.msk [vmem:[%s3228_s29 + $0x1f0] sm:$0xf] %vm2160_vm1, %v2740_v6  ;;  %2224 = vst.msk [vmem:[%s3228_s29 + $0xfc] sm:$0xf] %vm2160_vm1, %v2679_v9 }
 0x171   : > { %2288 = vst.msk [vmem:[%s3228_s29 + $0x1fc] sm:$0xf] %vm2160_vm1, %v2743_v10  ;;  %2222 = vst.msk [vmem:[%s3228_s29 + $0xf4] sm:$0xf] %vm2160_vm1, %v2677_v11 }
 0x172   : > { %2286 = vst.msk [vmem:[%s3228_s29 + $0x1f4] sm:$0xf] %vm2160_vm1, %v2741_v12 }
 0x173 PF: > { %s13_s12 = sadd.s32 1, %s3033_s12  }
 0x174   : > { %p10_p4 = scmp.ge.s32.totalorder %s13_s12, 4  }
 0x176   :  { %12 = sbr.rel (!%p10_p4) target bundleno = 1 (0x1), region = 62 }

</bundles_post_ra>
